<compile_context>
chip_gen: v7x
topology: tpu7x:2x2x1
jax: 0.10.0
libtpu: 0.0.40
codegen_flags: <defaults>
</compile_context>

<pallas_src>
import functools

import numpy as np
import jax
import jax.numpy as jnp
from jax import lax
from jax.experimental import pallas as pl
from jax.experimental.pallas import tpu as pltpu


# ----------------------------------------------------------------------------
# Fused XBlock kernel: one grid step == one batch element, everything in VMEM.
# ----------------------------------------------------------------------------
def _xblock_kernel(*refs, stride, Ho, Wo, has_se, has_shortcut):
    it = iter(refs)
    x_ref = next(it)                  # (1, s*s*Ho*Wo, Cin) bf16, phase-major rows
    w1_ref, s1_ref, b1_ref = next(it), next(it), next(it)
    w2_ref, m2_ref, s2_ref, b2_ref = next(it), next(it), next(it), next(it)
    if has_se:
        wse1_ref, bse1_ref = next(it), next(it)
        wse2_ref, bse2_ref = next(it), next(it)
    w3_ref, s3_ref, b3_ref = next(it), next(it), next(it)
    if has_shortcut:
        wsc_ref, ssc_ref, bsc_ref = next(it), next(it), next(it)
    o_ref = next(it)                  # (1, Ho*Wo, out_ch) f32
    y1p_ref = next(it)                # (s*s, 2*(Wo+1)+Ho*Wo, inter) f32 scratch

    s = stride
    hw = Ho * Wo
    pad = Wo + 1
    inter = w1_ref.shape[1]

    xb = x_ref[0]                                             # (s*s*hw, Cin) bf16

    # ---- conv_block_1: 1x1 conv + BN + ReLU (row order irrelevant for 1x1) --
    y1 = jnp.dot(xb, w1_ref[...], preferred_element_type=jnp.float32)
    y1 = jnp.maximum(y1 * s1_ref[...] + b1_ref[...], 0.0)     # (s*s*hw, inter)

    # ---- scatter conv1 output into flat per-phase planes (zero pad rows) ----
    y1p_ref[...] = jnp.zeros_like(y1p_ref)
    for p in range(s * s):
        y1p_ref[p, pad:pad + hw, :] = y1[p * hw:(p + 1) * hw, :]

    # ---- conv_block_2: grouped 3x3 stride-s conv + BN + ReLU ----------------
    # out[ho,wo] = sum_{ky,kx} y1[s*ho+ky-1, s*wo+kx-1] @ W2[ky,kx]
    # Each tap is a contiguous row-shifted window of one phase plane; boundary
    # (padding) rows are zeroed with a per-tap mask.  9 accumulated matmuls,
    # everything stays in VMEM.
    acc = jnp.zeros((hw, inter), jnp.float32)
    for ky in range(3):
        phy = (ky - 1) % s
        dy = (ky - 1 - phy) // s
        for kx in range(3):
            phx = (kx - 1) % s
            dx = (kx - 1 - phx) // s
            t = ky * 3 + kx
            off = pad + dy * Wo + dx
            win = y1p_ref[phy * s + phx, off:off + hw, :]     # (hw, inter) f32
            lhs = (win * m2_ref[t]).astype(jnp.bfloat16)
            acc = acc + jnp.dot(lhs, w2_ref[t],
                                preferred_element_type=jnp.float32)
    y2 = jnp.maximum(acc * s2_ref[...] + b2_ref[...], 0.0)    # (hw, inter) f32

    # ---- Squeeze-Excite: x1 = x1 * sigmoid(FC2(relu(FC1(avgpool(x1))))) -----
    if has_se:
        pooled = jnp.mean(y2, axis=0, keepdims=True)          # (1, inter)
        h = jnp.dot(pooled, wse1_ref[...],
                    preferred_element_type=jnp.float32) + bse1_ref[...]
        h = jnp.maximum(h, 0.0)
        z = jnp.dot(h, wse2_ref[...],
                    preferred_element_type=jnp.float32) + bse2_ref[...]
        sig = pl.reciprocal(1.0 + jnp.exp(-z), approx=True)   # sigmoid on EUP
        y2 = y2 * sig

    # ---- conv_block_3 (1x1+BN) + shortcut (1x1 stride-s+BN) + add + ReLU ----
    y3 = jnp.dot(y2.astype(jnp.bfloat16), w3_ref[...],
                 preferred_element_type=jnp.float32)
    y3 = y3 * s3_ref[...] + b3_ref[...]

    xs = xb[:hw, :]                   # phase (0,0) rows == x[:, ::s, ::s, :]
    if has_shortcut:
        sc = jnp.dot(xs, wsc_ref[...], preferred_element_type=jnp.float32)
        sc = sc * ssc_ref[...] + bsc_ref[...]
    else:
        sc = xs.astype(jnp.float32)

    o_ref[0] = jnp.maximum(y3 + sc, 0.0).astype(o_ref.dtype)


# ----------------------------------------------------------------------------
# Wrapper
# ----------------------------------------------------------------------------
def _full_spec(arr):
    zero = (0,) * arr.ndim
    return pl.BlockSpec(arr.shape, lambda b, _z=zero: _z)


def _conv2_tap_masks(s, Ho, Wo):
    """Per-tap validity masks (1 where the 3x3 tap reads a real input pixel)."""
    hw = Ho * Wo
    m = np.zeros((9, hw, 1), np.float32)
    for ky in range(3):
        dy = (ky - 1 - ((ky - 1) % s)) // s
        for kx in range(3):
            dx = (kx - 1 - ((kx - 1) % s)) // s
            t = ky * 3 + kx
            for ho in range(Ho):
                for wo in range(Wo):
                    if 0 <= ho + dy < Ho and 0 <= wo + dx < Wo:
                        m[t, ho * Wo + wo, 0] = 1.0
    return jnp.asarray(m)


def xblock_forward(x_nchw, P, cfg):
    s = cfg["stride"]
    inter = cfg["inter"]
    out_ch = cfg["out_ch"]
    has_se = cfg["has_se"]
    has_shortcut = cfg["has_shortcut"]
    Nb, Cin, H, W = x_nchw.shape
    assert H % s == 0 and W % s == 0, "spatial dims must be divisible by stride"
    Ho, Wo = H // s, W // s
    hw = Ho * Wo

    # NCHW -> NHWC -> phase-major rows: row ((ph*s+pw)*Ho + i)*Wo + j holds
    # x[n, s*i+ph, s*j+pw, :].  One cheap relayout pass; bf16 for the MXU.
    x = jnp.transpose(x_nchw, (0, 2, 3, 1))
    x_pm = x.reshape(Nb, Ho, s, Wo, s, Cin).transpose(0, 2, 4, 1, 3, 5)
    x_pm = x_pm.reshape(Nb, s * s * hw, Cin).astype(jnp.bfloat16)

    bf16 = lambda a: a.astype(jnp.bfloat16)
    masks = _conv2_tap_masks(s, Ho, Wo)

    args = [x_pm, bf16(P["w1"]), P["s1"], P["b1"],
            bf16(P["w2_taps"]), masks, P["s2"], P["b2"]]
    if has_se:
        args += [P["w_se1"], P["b_se1"], P["w_se2"], P["b_se2"]]
    args += [bf16(P["w3"]), P["s3"], P["b3"]]
    if has_shortcut:
        args += [bf16(P["w_sc"]), P["s_sc"], P["b_sc"]]

    in_specs = [pl.BlockSpec((1, s * s * hw, Cin), lambda b: (b, 0, 0))]
    in_specs += [_full_spec(a) for a in args[1:]]

    kernel = functools.partial(_xblock_kernel, stride=s, Ho=Ho, Wo=Wo,
                               has_se=has_se, has_shortcut=has_shortcut)

    out = pl.pallas_call(
        kernel,
        out_shape=jax.ShapeDtypeStruct((Nb, hw, out_ch), jnp.float32),
        grid_spec=pltpu.PrefetchScalarGridSpec(
            num_scalar_prefetch=0,
            grid=(Nb,),
            in_specs=in_specs,
            out_specs=pl.BlockSpec((1, hw, out_ch), lambda b: (b, 0, 0)),
            scratch_shapes=[
                pltpu.VMEM((s * s, 2 * (Wo + 1) + hw, inter), jnp.float32),
            ],
        ),
        compiler_params=pltpu.CompilerParams(
            dimension_semantics=("parallel",),
            vmem_limit_bytes=32 * 1024 * 1024,
        ),
    )(*args)

    out = out.reshape(Nb, Ho, Wo, out_ch)
    return jnp.transpose(out, (0, 3, 1, 2))                   # NCHW, f32


# ----------------------------------------------------------------------------
# Parameter construction (deterministic, synthetic; BN folded to scale/bias)
# ----------------------------------------------------------------------------
def init_xblock_params(key, in_ch, out_ch, bottleneck_ratio, group_width, stride,
                       se_ratio):
    inter = out_ch // bottleneck_ratio
    groups = inter // group_width
    gs = inter // groups
    se_c = in_ch // se_ratio if se_ratio is not None else None

    keys = iter(jax.random.split(key, 32))

    def nrm(shape, s=0.1):
        return (s * jax.random.normal(next(keys), shape)).astype(jnp.float32)

    def bn_fold(c):
        gamma = jax.random.uniform(next(keys), (c,), minval=0.5, maxval=1.5)
        beta = 0.1 * jax.random.normal(next(keys), (c,))
        mean = 0.1 * jax.random.normal(next(keys), (c,))
        var = jax.random.uniform(next(keys), (c,), minval=0.5, maxval=1.5)
        scale = gamma / jnp.sqrt(var + 1e-5)
        bias = beta - mean * scale
        return (scale.reshape(1, c).astype(jnp.float32),
                bias.reshape(1, c).astype(jnp.float32))

    P = {}
    # conv_block_1: 1x1 conv (in -> inter) + BN + ReLU
    P["w1"] = nrm((in_ch, inter))
    P["s1"], P["b1"] = bn_fold(inter)
    # conv_block_2: grouped 3x3 conv (PyTorch weight layout (Cout, Cin/g, 3, 3))
    w2_pt = nrm((inter, gs, 3, 3))
    P["s2"], P["b2"] = bn_fold(inter)
    # per-tap block-diagonal (inter, inter) weights for the in-VMEM tap matmuls
    w2_np = np.asarray(w2_pt)
    w2_taps = np.zeros((9, inter, inter), dtype=np.float32)
    for ky in range(3):
        for kx in range(3):
            t = ky * 3 + kx
            for co in range(inter):
                g = co // gs
                w2_taps[t, g * gs:(g + 1) * gs, co] = w2_np[co, :, ky, kx]
    P["w2_taps"] = jnp.asarray(w2_taps)
    # HWIO layout for the lax.conv reference check
    P["w2_hwio"] = jnp.transpose(w2_pt, (2, 3, 1, 0))
    # Squeeze-Excite
    if se_ratio is not None:
        P["w_se1"] = nrm((inter, se_c))
        P["b_se1"] = nrm((1, se_c))
        P["w_se2"] = nrm((se_c, inter))
        P["b_se2"] = nrm((1, inter))
    # conv_block_3: 1x1 conv (inter -> out) + BN
    P["w3"] = nrm((inter, out_ch))
    P["s3"], P["b3"] = bn_fold(out_ch)
    # shortcut
    has_shortcut = (stride != 1) or (in_ch != out_ch)
    if has_shortcut:
        P["w_sc"] = nrm((in_ch, out_ch))
        P["s_sc"], P["b_sc"] = bn_fold(out_ch)

    cfg = dict(stride=stride, groups=groups, inter=inter, out_ch=out_ch,
               has_se=se_ratio is not None, has_shortcut=has_shortcut)
    return P, cfg


# ----------------------------------------------------------------------------
# Pure-JAX reference (mirrors PyTorch forward semantics) for verification
# ----------------------------------------------------------------------------
def xblock_reference(x_nchw, P, cfg):
    stride = cfg["stride"]
    x = jnp.transpose(x_nchw, (0, 2, 3, 1)).astype(jnp.float32)
    y1 = jnp.maximum(jnp.einsum("nhwc,cd->nhwd", x, P["w1"]) * P["s1"][0]
                     + P["b1"][0], 0.0)
    y2 = lax.conv_general_dilated(
        y1, P["w2_hwio"], window_strides=(stride, stride),
        padding=((1, 1), (1, 1)), dimension_numbers=("NHWC", "HWIO", "NHWC"),
        feature_group_count=cfg["groups"])
    y2 = jnp.maximum(y2 * P["s2"][0] + P["b2"][0], 0.0)
    if cfg["has_se"]:
        pooled = jnp.mean(y2, axis=(1, 2))
        h = jnp.maximum(pooled @ P["w_se1"] + P["b_se1"][0], 0.0)
        s = 1.0 / (1.0 + jnp.exp(-(h @ P["w_se2"] + P["b_se2"][0])))
        y2 = y2 * s[:, None, None, :]
    y3 = jnp.einsum("nhwc,cd->nhwd", y2, P["w3"]) * P["s3"][0] + P["b3"][0]
    if cfg["has_shortcut"]:
        xs = x[:, ::stride, ::stride, :]
        sc = jnp.einsum("nhwc,cd->nhwd", xs, P["w_sc"]) * P["s_sc"][0] + P["b_sc"][0]
    else:
        sc = x
    out = jnp.maximum(y3 + sc, 0.0)
    return jnp.transpose(out, (0, 3, 1, 2))


# ----------------------------------------------------------------------------
if __name__ == "__main__":
    key = jax.random.PRNGKey(0)
    kx, kp = jax.random.split(key)

    # Small XBlock config: in=32, out=64, bottleneck_ratio=2 -> inter=32,
    # group_width=8 -> groups=4, stride=2, se_ratio=4 -> se_channels=8.
    in_ch, out_ch = 32, 64
    bottleneck_ratio, group_width, stride, se_ratio = 2, 8, 2, 4

    x = jax.random.normal(kx, (2, in_ch, 16, 16), dtype=jnp.float32)
    P, cfg = init_xblock_params(kp, in_ch, out_ch, bottleneck_ratio,
                                group_width, stride, se_ratio)

    fwd = jax.jit(lambda xx: xblock_forward(xx, P, cfg))
    out = jax.block_until_ready(fwd(x))

    ref = jax.block_until_ready(xblock_reference(x, P, cfg))
    np.testing.assert_allclose(np.asarray(out), np.asarray(ref),
                               rtol=5e-2, atol=5e-2)
    print("KERNEL_OK")
</pallas_src>

<mosaic_0001>
module attributes {stable_mosaic.version = 11 : i64} {
  func.func @_xblock_kernel(%arg0: i32, %arg1: memref<1x256x32xbf16, #tpu.memory_space<vmem>>, %arg2: memref<32x32xbf16, #tpu.memory_space<vmem>>, %arg3: memref<1x32xf32, #tpu.memory_space<vmem>>, %arg4: memref<1x32xf32, #tpu.memory_space<vmem>>, %arg5: memref<9x32x32xbf16, #tpu.memory_space<vmem>>, %arg6: memref<9x64x1xf32, #tpu.memory_space<vmem>>, %arg7: memref<1x32xf32, #tpu.memory_space<vmem>>, %arg8: memref<1x32xf32, #tpu.memory_space<vmem>>, %arg9: memref<32x8xf32, #tpu.memory_space<vmem>>, %arg10: memref<1x8xf32, #tpu.memory_space<vmem>>, %arg11: memref<8x32xf32, #tpu.memory_space<vmem>>, %arg12: memref<1x32xf32, #tpu.memory_space<vmem>>, %arg13: memref<32x64xbf16, #tpu.memory_space<vmem>>, %arg14: memref<1x64xf32, #tpu.memory_space<vmem>>, %arg15: memref<1x64xf32, #tpu.memory_space<vmem>>, %arg16: memref<32x64xbf16, #tpu.memory_space<vmem>>, %arg17: memref<1x64xf32, #tpu.memory_space<vmem>>, %arg18: memref<1x64xf32, #tpu.memory_space<vmem>>, %arg19: memref<1x64x64xf32, #tpu.memory_space<vmem>>, %arg20: memref<4x82x32xf32, #tpu.memory_space<vmem>>) attributes {dimension_semantics = [#tpu.dimension_semantics<parallel>], iteration_bounds = array<i64: 2>, scalar_prefetch = 0 : i64, scratch_operands = 1 : i64, tpu.core_type = #tpu.core_type<tc>, window_params = [{transform_indices = @transform_0, window_bounds = array<i64: 1, 256, 32>}, {pipeline_mode = #tpu.pipeline_mode<synchronous>, transform_indices = @transform_1, window_bounds = array<i64: 32, 32>}, {pipeline_mode = #tpu.pipeline_mode<synchronous>, transform_indices = @transform_2, window_bounds = array<i64: 1, 32>}, {pipeline_mode = #tpu.pipeline_mode<synchronous>, transform_indices = @transform_3, window_bounds = array<i64: 1, 32>}, {pipeline_mode = #tpu.pipeline_mode<synchronous>, transform_indices = @transform_4, window_bounds = array<i64: 9, 32, 32>}, {pipeline_mode = #tpu.pipeline_mode<synchronous>, transform_indices = @transform_5, window_bounds = array<i64: 9, 64, 1>}, {pipeline_mode = #tpu.pipeline_mode<synchronous>, transform_indices = @transform_6, window_bounds = array<i64: 1, 32>}, {pipeline_mode = #tpu.pipeline_mode<synchronous>, transform_indices = @transform_7, window_bounds = array<i64: 1, 32>}, {pipeline_mode = #tpu.pipeline_mode<synchronous>, transform_indices = @transform_8, window_bounds = array<i64: 32, 8>}, {pipeline_mode = #tpu.pipeline_mode<synchronous>, transform_indices = @transform_9, window_bounds = array<i64: 1, 8>}, {pipeline_mode = #tpu.pipeline_mode<synchronous>, transform_indices = @transform_10, window_bounds = array<i64: 8, 32>}, {pipeline_mode = #tpu.pipeline_mode<synchronous>, transform_indices = @transform_11, window_bounds = array<i64: 1, 32>}, {pipeline_mode = #tpu.pipeline_mode<synchronous>, transform_indices = @transform_12, window_bounds = array<i64: 32, 64>}, {pipeline_mode = #tpu.pipeline_mode<synchronous>, transform_indices = @transform_13, window_bounds = array<i64: 1, 64>}, {pipeline_mode = #tpu.pipeline_mode<synchronous>, transform_indices = @transform_14, window_bounds = array<i64: 1, 64>}, {pipeline_mode = #tpu.pipeline_mode<synchronous>, transform_indices = @transform_15, window_bounds = array<i64: 32, 64>}, {pipeline_mode = #tpu.pipeline_mode<synchronous>, transform_indices = @transform_16, window_bounds = array<i64: 1, 64>}, {pipeline_mode = #tpu.pipeline_mode<synchronous>, transform_indices = @transform_17, window_bounds = array<i64: 1, 64>}, {transform_indices = @transform_18, window_bounds = array<i64: 1, 64, 64>}]} {
    %c0 = arith.constant 0 : index
    %c0_0 = arith.constant 0 : index
    %c0_1 = arith.constant 0 : index
    %0 = vector.load %arg1[%c0, %c0_0, %c0_1] : memref<1x256x32xbf16, #tpu.memory_space<vmem>>, vector<1x256x32xbf16>
    %1 = vector.shape_cast %0 : vector<1x256x32xbf16> to vector<256x32xbf16>
    %c0_2 = arith.constant 0 : index
    %c0_3 = arith.constant 0 : index
    %2 = vector.load %arg2[%c0_2, %c0_3] : memref<32x32xbf16, #tpu.memory_space<vmem>>, vector<32x32xbf16>
    %cst = arith.constant dense<0.000000e+00> : vector<256x32xf32>
    %3 = tpu.matmul %1, %2, %cst {dimension_numbers = #tpu.dot_dimension_numbers<[1], [0], [0], [1], [0, 0, 1, 1], [], []>} : vector<256x32xbf16>, vector<32x32xbf16>, vector<256x32xf32> -> vector<256x32xf32>
    %c0_4 = arith.constant 0 : index
    %c0_5 = arith.constant 0 : index
    %4 = vector.load %arg3[%c0_4, %c0_5] : memref<1x32xf32, #tpu.memory_space<vmem>>, vector<1x32xf32>
    %5 = vector.broadcast %4 : vector<1x32xf32> to vector<256x32xf32>
    %6 = arith.mulf %3, %5 : vector<256x32xf32>
    %c0_6 = arith.constant 0 : index
    %c0_7 = arith.constant 0 : index
    %7 = vector.load %arg4[%c0_6, %c0_7] : memref<1x32xf32, #tpu.memory_space<vmem>>, vector<1x32xf32>
    %8 = vector.broadcast %7 : vector<1x32xf32> to vector<256x32xf32>
    %9 = arith.addf %6, %8 : vector<256x32xf32>
    %cst_8 = arith.constant 0.000000e+00 : f32
    %10 = vector.broadcast %cst_8 : f32 to vector<256x32xf32>
    %11 = arith.maximumf %9, %10 : vector<256x32xf32>
    %cst_9 = arith.constant 0.000000e+00 : f32
    %12 = vector.broadcast %cst_9 : f32 to vector<4x82x32xf32>
    %c0_10 = arith.constant 0 : index
    %c0_11 = arith.constant 0 : index
    %c0_12 = arith.constant 0 : index
    %13 = vector.load %arg20[%c0_10, %c0_11, %c0_12] : memref<4x82x32xf32, #tpu.memory_space<vmem>>, vector<4x82x32xf32>
    tpu.vector_store %arg20[%c0_10, %c0_11, %c0_12], %12 {strides = array<i32>} : memref<4x82x32xf32, #tpu.memory_space<vmem>>, vector<4x82x32xf32>,
    %14 = vector.extract_strided_slice %11 {offsets = [0, 0], sizes = [64, 32], strides = [1, 1]} : vector<256x32xf32> to vector<64x32xf32>
    %c0_13 = arith.constant 0 : index
    %c9 = arith.constant 9 : index
    %c0_14 = arith.constant 0 : index
    %15 = vector.load %arg20[%c0_13, %c9, %c0_14] : memref<4x82x32xf32, #tpu.memory_space<vmem>>, vector<1x64x32xf32>
    %16 = vector.shape_cast %15 : vector<1x64x32xf32> to vector<64x32xf32>
    %17 = vector.shape_cast %14 : vector<64x32xf32> to vector<1x64x32xf32>
    tpu.vector_store %arg20[%c0_13, %c9, %c0_14], %17 {strides = array<i32>} : memref<4x82x32xf32, #tpu.memory_space<vmem>>, vector<1x64x32xf32>,
    %18 = vector.extract_strided_slice %11 {offsets = [64, 0], sizes = [64, 32], strides = [1, 1]} : vector<256x32xf32> to vector<64x32xf32>
    %c1 = arith.constant 1 : index
    %c9_15 = arith.constant 9 : index
    %c0_16 = arith.constant 0 : index
    %19 = vector.load %arg20[%c1, %c9_15, %c0_16] : memref<4x82x32xf32, #tpu.memory_space<vmem>>, vector<1x64x32xf32>
    %20 = vector.shape_cast %19 : vector<1x64x32xf32> to vector<64x32xf32>
    %21 = vector.shape_cast %18 : vector<64x32xf32> to vector<1x64x32xf32>
    tpu.vector_store %arg20[%c1, %c9_15, %c0_16], %21 {strides = array<i32>} : memref<4x82x32xf32, #tpu.memory_space<vmem>>, vector<1x64x32xf32>,
    %22 = vector.extract_strided_slice %11 {offsets = [128, 0], sizes = [64, 32], strides = [1, 1]} : vector<256x32xf32> to vector<64x32xf32>
    %c2 = arith.constant 2 : index
    %c9_17 = arith.constant 9 : index
    %c0_18 = arith.constant 0 : index
    %23 = vector.load %arg20[%c2, %c9_17, %c0_18] : memref<4x82x32xf32, #tpu.memory_space<vmem>>, vector<1x64x32xf32>
    %24 = vector.shape_cast %23 : vector<1x64x32xf32> to vector<64x32xf32>
    %25 = vector.shape_cast %22 : vector<64x32xf32> to vector<1x64x32xf32>
    tpu.vector_store %arg20[%c2, %c9_17, %c0_18], %25 {strides = array<i32>} : memref<4x82x32xf32, #tpu.memory_space<vmem>>, vector<1x64x32xf32>,
    %26 = vector.extract_strided_slice %11 {offsets = [192, 0], sizes = [64, 32], strides = [1, 1]} : vector<256x32xf32> to vector<64x32xf32>
    %c3 = arith.constant 3 : index
    %c9_19 = arith.constant 9 : index
    %c0_20 = arith.constant 0 : index
    %27 = vector.load %arg20[%c3, %c9_19, %c0_20] : memref<4x82x32xf32, #tpu.memory_space<vmem>>, vector<1x64x32xf32>
    %28 = vector.shape_cast %27 : vector<1x64x32xf32> to vector<64x32xf32>
    %29 = vector.shape_cast %26 : vector<64x32xf32> to vector<1x64x32xf32>
    tpu.vector_store %arg20[%c3, %c9_19, %c0_20], %29 {strides = array<i32>} : memref<4x82x32xf32, #tpu.memory_space<vmem>>, vector<1x64x32xf32>,
    %cst_21 = arith.constant 0.000000e+00 : f32
    %30 = vector.broadcast %cst_21 : f32 to vector<64x32xf32>
    %c3_22 = arith.constant 3 : index
    %c0_23 = arith.constant 0 : index
    %c0_24 = arith.constant 0 : index
    %31 = vector.load %arg20[%c3_22, %c0_23, %c0_24] : memref<4x82x32xf32, #tpu.memory_space<vmem>>, vector<1x64x32xf32>
    %32 = vector.shape_cast %31 : vector<1x64x32xf32> to vector<64x32xf32>
    %c0_25 = arith.constant 0 : index
    %c0_26 = arith.constant 0 : index
    %c0_27 = arith.constant 0 : index
    %33 = vector.load %arg6[%c0_25, %c0_26, %c0_27] : memref<9x64x1xf32, #tpu.memory_space<vmem>>, vector<1x64x1xf32>
    %34 = vector.shape_cast %33 : vector<1x64x1xf32> to vector<64x1xf32>
    %35 = vector.broadcast %34 : vector<64x1xf32> to vector<64x32xf32>
    %36 = arith.mulf %32, %35 : vector<64x32xf32>
    %37 = arith.truncf %36 : vector<64x32xf32> to vector<64x32xbf16>
    %c0_28 = arith.constant 0 : index
    %c0_29 = arith.constant 0 : index
    %c0_30 = arith.constant 0 : index
    %38 = vector.load %arg5[%c0_28, %c0_29, %c0_30] : memref<9x32x32xbf16, #tpu.memory_space<vmem>>, vector<1x32x32xbf16>
    %39 = vector.shape_cast %38 : vector<1x32x32xbf16> to vector<32x32xbf16>
    %cst_31 = arith.constant dense<0.000000e+00> : vector<64x32xf32>
    %40 = tpu.matmul %37, %39, %cst_31 {dimension_numbers = #tpu.dot_dimension_numbers<[1], [0], [0], [1], [0, 0, 1, 1], [], []>} : vector<64x32xbf16>, vector<32x32xbf16>, vector<64x32xf32> -> vector<64x32xf32>
    %41 = arith.addf %30, %40 : vector<64x32xf32>
    %c2_32 = arith.constant 2 : index
    %c1_33 = arith.constant 1 : index
    %c0_34 = arith.constant 0 : index
    %42 = vector.load %arg20[%c2_32, %c1_33, %c0_34] : memref<4x82x32xf32, #tpu.memory_space<vmem>>, vector<1x64x32xf32>
    %43 = vector.shape_cast %42 : vector<1x64x32xf32> to vector<64x32xf32>
    %c1_35 = arith.constant 1 : index
    %c0_36 = arith.constant 0 : index
    %c0_37 = arith.constant 0 : index
    %44 = vector.load %arg6[%c1_35, %c0_36, %c0_37] : memref<9x64x1xf32, #tpu.memory_space<vmem>>, vector<1x64x1xf32>
    %45 = vector.shape_cast %44 : vector<1x64x1xf32> to vector<64x1xf32>
    %46 = vector.broadcast %45 : vector<64x1xf32> to vector<64x32xf32>
    %47 = arith.mulf %43, %46 : vector<64x32xf32>
    %48 = arith.truncf %47 : vector<64x32xf32> to vector<64x32xbf16>
    %c1_38 = arith.constant 1 : index
    %c0_39 = arith.constant 0 : index
    %c0_40 = arith.constant 0 : index
    %49 = vector.load %arg5[%c1_38, %c0_39, %c0_40] : memref<9x32x32xbf16, #tpu.memory_space<vmem>>, vector<1x32x32xbf16>
    %50 = vector.shape_cast %49 : vector<1x32x32xbf16> to vector<32x32xbf16>
    %cst_41 = arith.constant dense<0.000000e+00> : vector<64x32xf32>
    %51 = tpu.matmul %48, %50, %cst_41 {dimension_numbers = #tpu.dot_dimension_numbers<[1], [0], [0], [1], [0, 0, 1, 1], [], []>} : vector<64x32xbf16>, vector<32x32xbf16>, vector<64x32xf32> -> vector<64x32xf32>
    %52 = arith.addf %41, %51 : vector<64x32xf32>
    %c3_42 = arith.constant 3 : index
    %c1_43 = arith.constant 1 : index
    %c0_44 = arith.constant 0 : index
    %53 = vector.load %arg20[%c3_42, %c1_43, %c0_44] : memref<4x82x32xf32, #tpu.memory_space<vmem>>, vector<1x64x32xf32>
    %54 = vector.shape_cast %53 : vector<1x64x32xf32> to vector<64x32xf32>
    %c2_45 = arith.constant 2 : index
    %c0_46 = arith.constant 0 : index
    %c0_47 = arith.constant 0 : index
    %55 = vector.load %arg6[%c2_45, %c0_46, %c0_47] : memref<9x64x1xf32, #tpu.memory_space<vmem>>, vector<1x64x1xf32>
    %56 = vector.shape_cast %55 : vector<1x64x1xf32> to vector<64x1xf32>
    %57 = vector.broadcast %56 : vector<64x1xf32> to vector<64x32xf32>
    %58 = arith.mulf %54, %57 : vector<64x32xf32>
    %59 = arith.truncf %58 : vector<64x32xf32> to vector<64x32xbf16>
    %c2_48 = arith.constant 2 : index
    %c0_49 = arith.constant 0 : index
    %c0_50 = arith.constant 0 : index
    %60 = vector.load %arg5[%c2_48, %c0_49, %c0_50] : memref<9x32x32xbf16, #tpu.memory_space<vmem>>, vector<1x32x32xbf16>
    %61 = vector.shape_cast %60 : vector<1x32x32xbf16> to vector<32x32xbf16>
    %cst_51 = arith.constant dense<0.000000e+00> : vector<64x32xf32>
    %62 = tpu.matmul %59, %61, %cst_51 {dimension_numbers = #tpu.dot_dimension_numbers<[1], [0], [0], [1], [0, 0, 1, 1], [], []>} : vector<64x32xbf16>, vector<32x32xbf16>, vector<64x32xf32> -> vector<64x32xf32>
    %63 = arith.addf %52, %62 : vector<64x32xf32>
    %c1_52 = arith.constant 1 : index
    %c8 = arith.constant 8 : index
    %c0_53 = arith.constant 0 : index
    %64 = vector.load %arg20[%c1_52, %c8, %c0_53] : memref<4x82x32xf32, #tpu.memory_space<vmem>>, vector<1x64x32xf32>
    %65 = vector.shape_cast %64 : vector<1x64x32xf32> to vector<64x32xf32>
    %c3_54 = arith.constant 3 : index
    %c0_55 = arith.constant 0 : index
    %c0_56 = arith.constant 0 : index
    %66 = vector.load %arg6[%c3_54, %c0_55, %c0_56] : memref<9x64x1xf32, #tpu.memory_space<vmem>>, vector<1x64x1xf32>
    %67 = vector.shape_cast %66 : vector<1x64x1xf32> to vector<64x1xf32>
    %68 = vector.broadcast %67 : vector<64x1xf32> to vector<64x32xf32>
    %69 = arith.mulf %65, %68 : vector<64x32xf32>
    %70 = arith.truncf %69 : vector<64x32xf32> to vector<64x32xbf16>
    %c3_57 = arith.constant 3 : index
    %c0_58 = arith.constant 0 : index
    %c0_59 = arith.constant 0 : index
    %71 = vector.load %arg5[%c3_57, %c0_58, %c0_59] : memref<9x32x32xbf16, #tpu.memory_space<vmem>>, vector<1x32x32xbf16>
    %72 = vector.shape_cast %71 : vector<1x32x32xbf16> to vector<32x32xbf16>
    %cst_60 = arith.constant dense<0.000000e+00> : vector<64x32xf32>
    %73 = tpu.matmul %70, %72, %cst_60 {dimension_numbers = #tpu.dot_dimension_numbers<[1], [0], [0], [1], [0, 0, 1, 1], [], []>} : vector<64x32xbf16>, vector<32x32xbf16>, vector<64x32xf32> -> vector<64x32xf32>
    %74 = arith.addf %63, %73 : vector<64x32xf32>
    %c0_61 = arith.constant 0 : index
    %c9_62 = arith.constant 9 : index
    %c0_63 = arith.constant 0 : index
    %75 = vector.load %arg20[%c0_61, %c9_62, %c0_63] : memref<4x82x32xf32, #tpu.memory_space<vmem>>, vector<1x64x32xf32>
    %76 = vector.shape_cast %75 : vector<1x64x32xf32> to vector<64x32xf32>
    %c4 = arith.constant 4 : index
    %c0_64 = arith.constant 0 : index
    %c0_65 = arith.constant 0 : index
    %77 = vector.load %arg6[%c4, %c0_64, %c0_65] : memref<9x64x1xf32, #tpu.memory_space<vmem>>, vector<1x64x1xf32>
    %78 = vector.shape_cast %77 : vector<1x64x1xf32> to vector<64x1xf32>
    %79 = vector.broadcast %78 : vector<64x1xf32> to vector<64x32xf32>
    %80 = arith.mulf %76, %79 : vector<64x32xf32>
    %81 = arith.truncf %80 : vector<64x32xf32> to vector<64x32xbf16>
    %c4_66 = arith.constant 4 : index
    %c0_67 = arith.constant 0 : index
    %c0_68 = arith.constant 0 : index
    %82 = vector.load %arg5[%c4_66, %c0_67, %c0_68] : memref<9x32x32xbf16, #tpu.memory_space<vmem>>, vector<1x32x32xbf16>
    %83 = vector.shape_cast %82 : vector<1x32x32xbf16> to vector<32x32xbf16>
    %cst_69 = arith.constant dense<0.000000e+00> : vector<64x32xf32>
    %84 = tpu.matmul %81, %83, %cst_69 {dimension_numbers = #tpu.dot_dimension_numbers<[1], [0], [0], [1], [0, 0, 1, 1], [], []>} : vector<64x32xbf16>, vector<32x32xbf16>, vector<64x32xf32> -> vector<64x32xf32>
    %85 = arith.addf %74, %84 : vector<64x32xf32>
    %c1_70 = arith.constant 1 : index
    %c9_71 = arith.constant 9 : index
    %c0_72 = arith.constant 0 : index
    %86 = vector.load %arg20[%c1_70, %c9_71, %c0_72] : memref<4x82x32xf32, #tpu.memory_space<vmem>>, vector<1x64x32xf32>
    %87 = vector.shape_cast %86 : vector<1x64x32xf32> to vector<64x32xf32>
    %c5 = arith.constant 5 : index
    %c0_73 = arith.constant 0 : index
    %c0_74 = arith.constant 0 : index
    %88 = vector.load %arg6[%c5, %c0_73, %c0_74] : memref<9x64x1xf32, #tpu.memory_space<vmem>>, vector<1x64x1xf32>
    %89 = vector.shape_cast %88 : vector<1x64x1xf32> to vector<64x1xf32>
    %90 = vector.broadcast %89 : vector<64x1xf32> to vector<64x32xf32>
    %91 = arith.mulf %87, %90 : vector<64x32xf32>
    %92 = arith.truncf %91 : vector<64x32xf32> to vector<64x32xbf16>
    %c5_75 = arith.constant 5 : index
    %c0_76 = arith.constant 0 : index
    %c0_77 = arith.constant 0 : index
    %93 = vector.load %arg5[%c5_75, %c0_76, %c0_77] : memref<9x32x32xbf16, #tpu.memory_space<vmem>>, vector<1x32x32xbf16>
    %94 = vector.shape_cast %93 : vector<1x32x32xbf16> to vector<32x32xbf16>
    %cst_78 = arith.constant dense<0.000000e+00> : vector<64x32xf32>
    %95 = tpu.matmul %92, %94, %cst_78 {dimension_numbers = #tpu.dot_dimension_numbers<[1], [0], [0], [1], [0, 0, 1, 1], [], []>} : vector<64x32xbf16>, vector<32x32xbf16>, vector<64x32xf32> -> vector<64x32xf32>
    %96 = arith.addf %85, %95 : vector<64x32xf32>
    %c3_79 = arith.constant 3 : index
    %c8_80 = arith.constant 8 : index
    %c0_81 = arith.constant 0 : index
    %97 = vector.load %arg20[%c3_79, %c8_80, %c0_81] : memref<4x82x32xf32, #tpu.memory_space<vmem>>, vector<1x64x32xf32>
    %98 = vector.shape_cast %97 : vector<1x64x32xf32> to vector<64x32xf32>
    %c6 = arith.constant 6 : index
    %c0_82 = arith.constant 0 : index
    %c0_83 = arith.constant 0 : index
    %99 = vector.load %arg6[%c6, %c0_82, %c0_83] : memref<9x64x1xf32, #tpu.memory_space<vmem>>, vector<1x64x1xf32>
    %100 = vector.shape_cast %99 : vector<1x64x1xf32> to vector<64x1xf32>
    %101 = vector.broadcast %100 : vector<64x1xf32> to vector<64x32xf32>
    %102 = arith.mulf %98, %101 : vector<64x32xf32>
    %103 = arith.truncf %102 : vector<64x32xf32> to vector<64x32xbf16>
    %c6_84 = arith.constant 6 : index
    %c0_85 = arith.constant 0 : index
    %c0_86 = arith.constant 0 : index
    %104 = vector.load %arg5[%c6_84, %c0_85, %c0_86] : memref<9x32x32xbf16, #tpu.memory_space<vmem>>, vector<1x32x32xbf16>
    %105 = vector.shape_cast %104 : vector<1x32x32xbf16> to vector<32x32xbf16>
    %cst_87 = arith.constant dense<0.000000e+00> : vector<64x32xf32>
    %106 = tpu.matmul %103, %105, %cst_87 {dimension_numbers = #tpu.dot_dimension_numbers<[1], [0], [0], [1], [0, 0, 1, 1], [], []>} : vector<64x32xbf16>, vector<32x32xbf16>, vector<64x32xf32> -> vector<64x32xf32>
    %107 = arith.addf %96, %106 : vector<64x32xf32>
    %c2_88 = arith.constant 2 : index
    %c9_89 = arith.constant 9 : index
    %c0_90 = arith.constant 0 : index
    %108 = vector.load %arg20[%c2_88, %c9_89, %c0_90] : memref<4x82x32xf32, #tpu.memory_space<vmem>>, vector<1x64x32xf32>
    %109 = vector.shape_cast %108 : vector<1x64x32xf32> to vector<64x32xf32>
    %c7 = arith.constant 7 : index
    %c0_91 = arith.constant 0 : index
    %c0_92 = arith.constant 0 : index
    %110 = vector.load %arg6[%c7, %c0_91, %c0_92] : memref<9x64x1xf32, #tpu.memory_space<vmem>>, vector<1x64x1xf32>
    %111 = vector.shape_cast %110 : vector<1x64x1xf32> to vector<64x1xf32>
    %112 = vector.broadcast %111 : vector<64x1xf32> to vector<64x32xf32>
    %113 = arith.mulf %109, %112 : vector<64x32xf32>
    %114 = arith.truncf %113 : vector<64x32xf32> to vector<64x32xbf16>
    %c7_93 = arith.constant 7 : index
    %c0_94 = arith.constant 0 : index
    %c0_95 = arith.constant 0 : index
    %115 = vector.load %arg5[%c7_93, %c0_94, %c0_95] : memref<9x32x32xbf16, #tpu.memory_space<vmem>>, vector<1x32x32xbf16>
    %116 = vector.shape_cast %115 : vector<1x32x32xbf16> to vector<32x32xbf16>
    %cst_96 = arith.constant dense<0.000000e+00> : vector<64x32xf32>
    %117 = tpu.matmul %114, %116, %cst_96 {dimension_numbers = #tpu.dot_dimension_numbers<[1], [0], [0], [1], [0, 0, 1, 1], [], []>} : vector<64x32xbf16>, vector<32x32xbf16>, vector<64x32xf32> -> vector<64x32xf32>
    %118 = arith.addf %107, %117 : vector<64x32xf32>
    %c3_97 = arith.constant 3 : index
    %c9_98 = arith.constant 9 : index
    %c0_99 = arith.constant 0 : index
    %119 = vector.load %arg20[%c3_97, %c9_98, %c0_99] : memref<4x82x32xf32, #tpu.memory_space<vmem>>, vector<1x64x32xf32>
    %120 = vector.shape_cast %119 : vector<1x64x32xf32> to vector<64x32xf32>
    %c8_100 = arith.constant 8 : index
    %c0_101 = arith.constant 0 : index
    %c0_102 = arith.constant 0 : index
    %121 = vector.load %arg6[%c8_100, %c0_101, %c0_102] : memref<9x64x1xf32, #tpu.memory_space<vmem>>, vector<1x64x1xf32>
    %122 = vector.shape_cast %121 : vector<1x64x1xf32> to vector<64x1xf32>
    %123 = vector.broadcast %122 : vector<64x1xf32> to vector<64x32xf32>
    %124 = arith.mulf %120, %123 : vector<64x32xf32>
    %125 = arith.truncf %124 : vector<64x32xf32> to vector<64x32xbf16>
    %c8_103 = arith.constant 8 : index
    %c0_104 = arith.constant 0 : index
    %c0_105 = arith.constant 0 : index
    %126 = vector.load %arg5[%c8_103, %c0_104, %c0_105] : memref<9x32x32xbf16, #tpu.memory_space<vmem>>, vector<1x32x32xbf16>
    %127 = vector.shape_cast %126 : vector<1x32x32xbf16> to vector<32x32xbf16>
    %cst_106 = arith.constant dense<0.000000e+00> : vector<64x32xf32>
    %128 = tpu.matmul %125, %127, %cst_106 {dimension_numbers = #tpu.dot_dimension_numbers<[1], [0], [0], [1], [0, 0, 1, 1], [], []>} : vector<64x32xbf16>, vector<32x32xbf16>, vector<64x32xf32> -> vector<64x32xf32>
    %129 = arith.addf %118, %128 : vector<64x32xf32>
    %c0_107 = arith.constant 0 : index
    %c0_108 = arith.constant 0 : index
    %130 = vector.load %arg7[%c0_107, %c0_108] : memref<1x32xf32, #tpu.memory_space<vmem>>, vector<1x32xf32>
    %131 = vector.broadcast %130 : vector<1x32xf32> to vector<64x32xf32>
    %132 = arith.mulf %129, %131 : vector<64x32xf32>
    %c0_109 = arith.constant 0 : index
    %c0_110 = arith.constant 0 : index
    %133 = vector.load %arg8[%c0_109, %c0_110] : memref<1x32xf32, #tpu.memory_space<vmem>>, vector<1x32xf32>
    %134 = vector.broadcast %133 : vector<1x32xf32> to vector<64x32xf32>
    %135 = arith.addf %132, %134 : vector<64x32xf32>
    %cst_111 = arith.constant 0.000000e+00 : f32
    %136 = vector.broadcast %cst_111 : f32 to vector<64x32xf32>
    %137 = arith.maximumf %135, %136 : vector<64x32xf32>
    %cst_112 = arith.constant dense<0.000000e+00> : vector<32xf32>
    %138 = vector.multi_reduction <add>, %137, %cst_112 [0] : vector<64x32xf32> to vector<32xf32>
    %139 = vector.shape_cast %138 : vector<32xf32> to vector<1x32xf32>
    %cst_113 = arith.constant 6.400000e+01 : f32
    %140 = vector.broadcast %cst_113 : f32 to vector<1x32xf32>
    %141 = arith.divf %139, %140 : vector<1x32xf32>
    %c0_114 = arith.constant 0 : index
    %c0_115 = arith.constant 0 : index
    %142 = vector.load %arg9[%c0_114, %c0_115] : memref<32x8xf32, #tpu.memory_space<vmem>>, vector<32x8xf32>
    %cst_116 = arith.constant dense<0.000000e+00> : vector<1x8xf32>
    %143 = tpu.matmul %141, %142, %cst_116 {dimension_numbers = #tpu.dot_dimension_numbers<[1], [0], [0], [1], [0, 0, 1, 1], [], []>} : vector<1x32xf32>, vector<32x8xf32>, vector<1x8xf32> -> vector<1x8xf32>
    %c0_117 = arith.constant 0 : index
    %c0_118 = arith.constant 0 : index
    %144 = vector.load %arg10[%c0_117, %c0_118] : memref<1x8xf32, #tpu.memory_space<vmem>>, vector<1x8xf32>
    %145 = arith.addf %143, %144 : vector<1x8xf32>
    %cst_119 = arith.constant 0.000000e+00 : f32
    %146 = vector.broadcast %cst_119 : f32 to vector<1x8xf32>
    %147 = arith.maximumf %145, %146 : vector<1x8xf32>
    %c0_120 = arith.constant 0 : index
    %c0_121 = arith.constant 0 : index
    %148 = vector.load %arg11[%c0_120, %c0_121] : memref<8x32xf32, #tpu.memory_space<vmem>>, vector<8x32xf32>
    %cst_122 = arith.constant dense<0.000000e+00> : vector<1x32xf32>
    %149 = tpu.matmul %147, %148, %cst_122 {dimension_numbers = #tpu.dot_dimension_numbers<[1], [0], [0], [1], [0, 0, 1, 1], [], []>} : vector<1x8xf32>, vector<8x32xf32>, vector<1x32xf32> -> vector<1x32xf32>
    %c0_123 = arith.constant 0 : index
    %c0_124 = arith.constant 0 : index
    %150 = vector.load %arg12[%c0_123, %c0_124] : memref<1x32xf32, #tpu.memory_space<vmem>>, vector<1x32xf32>
    %151 = arith.addf %149, %150 : vector<1x32xf32>
    %cst_125 = arith.constant 0.000000e+00 : f32
    %152 = vector.broadcast %cst_125 : f32 to vector<1x32xf32>
    %153 = arith.subf %152, %151 : vector<1x32xf32>
    %154 = math.exp %153 : vector<1x32xf32>
    %cst_126 = arith.constant 1.000000e+00 : f32
    %155 = vector.broadcast %cst_126 : f32 to vector<1x32xf32>
    %156 = arith.addf %155, %154 : vector<1x32xf32>
    %157 = tpu.reciprocal %156 {approx = true} : vector<1x32xf32> -> vector<1x32xf32>
    %158 = vector.broadcast %157 : vector<1x32xf32> to vector<64x32xf32>
    %159 = arith.mulf %137, %158 : vector<64x32xf32>
    %160 = arith.truncf %159 : vector<64x32xf32> to vector<64x32xbf16>
    %c0_127 = arith.constant 0 : index
    %c0_128 = arith.constant 0 : index
    %161 = vector.load %arg13[%c0_127, %c0_128] : memref<32x64xbf16, #tpu.memory_space<vmem>>, vector<32x64xbf16>
    %cst_129 = arith.constant dense<0.000000e+00> : vector<64x64xf32>
    %162 = tpu.matmul %160, %161, %cst_129 {dimension_numbers = #tpu.dot_dimension_numbers<[1], [0], [0], [1], [0, 0, 1, 1], [], []>} : vector<64x32xbf16>, vector<32x64xbf16>, vector<64x64xf32> -> vector<64x64xf32>
    %c0_130 = arith.constant 0 : index
    %c0_131 = arith.constant 0 : index
    %163 = vector.load %arg14[%c0_130, %c0_131] : memref<1x64xf32, #tpu.memory_space<vmem>>, vector<1x64xf32>
    %164 = vector.broadcast %163 : vector<1x64xf32> to vector<64x64xf32>
    %165 = arith.mulf %162, %164 : vector<64x64xf32>
    %c0_132 = arith.constant 0 : index
    %c0_133 = arith.constant 0 : index
    %166 = vector.load %arg15[%c0_132, %c0_133] : memref<1x64xf32, #tpu.memory_space<vmem>>, vector<1x64xf32>
    %167 = vector.broadcast %166 : vector<1x64xf32> to vector<64x64xf32>
    %168 = arith.addf %165, %167 : vector<64x64xf32>
    %169 = vector.extract_strided_slice %1 {offsets = [0, 0], sizes = [64, 32], strides = [1, 1]} : vector<256x32xbf16> to vector<64x32xbf16>
    %c0_134 = arith.constant 0 : index
    %c0_135 = arith.constant 0 : index
    %170 = vector.load %arg16[%c0_134, %c0_135] : memref<32x64xbf16, #tpu.memory_space<vmem>>, vector<32x64xbf16>
    %cst_136 = arith.constant dense<0.000000e+00> : vector<64x64xf32>
    %171 = tpu.matmul %169, %170, %cst_136 {dimension_numbers = #tpu.dot_dimension_numbers<[1], [0], [0], [1], [0, 0, 1, 1], [], []>} : vector<64x32xbf16>, vector<32x64xbf16>, vector<64x64xf32> -> vector<64x64xf32>
    %c0_137 = arith.constant 0 : index
    %c0_138 = arith.constant 0 : index
    %172 = vector.load %arg17[%c0_137, %c0_138] : memref<1x64xf32, #tpu.memory_space<vmem>>, vector<1x64xf32>
    %173 = vector.broadcast %172 : vector<1x64xf32> to vector<64x64xf32>
    %174 = arith.mulf %171, %173 : vector<64x64xf32>
    %c0_139 = arith.constant 0 : index
    %c0_140 = arith.constant 0 : index
    %175 = vector.load %arg18[%c0_139, %c0_140] : memref<1x64xf32, #tpu.memory_space<vmem>>, vector<1x64xf32>
    %176 = vector.broadcast %175 : vector<1x64xf32> to vector<64x64xf32>
    %177 = arith.addf %174, %176 : vector<64x64xf32>
    %178 = arith.addf %168, %177 : vector<64x64xf32>
    %cst_141 = arith.constant 0.000000e+00 : f32
    %179 = vector.broadcast %cst_141 : f32 to vector<64x64xf32>
    %180 = arith.maximumf %178, %179 : vector<64x64xf32>
    %c0_142 = arith.constant 0 : index
    %c0_143 = arith.constant 0 : index
    %c0_144 = arith.constant 0 : index
    %181 = vector.load %arg19[%c0_142, %c0_143, %c0_144] : memref<1x64x64xf32, #tpu.memory_space<vmem>>, vector<1x64x64xf32>
    %182 = vector.shape_cast %181 : vector<1x64x64xf32> to vector<64x64xf32>
    %183 = vector.shape_cast %180 : vector<64x64xf32> to vector<1x64x64xf32>
    tpu.vector_store %arg19[%c0_142, %c0_143, %c0_144], %183 {strides = array<i32>} : memref<1x64x64xf32, #tpu.memory_space<vmem>>, vector<1x64x64xf32>,
    return
  }
  func.func @transform_0(%arg0: i32) -> (i32, i32, i32) {
    %c0_i32 = arith.constant 0 : i32
    %c0_i32_0 = arith.constant 0 : i32
    %c0_i32_1 = arith.constant 0 : i32
    return %arg0, %c0_i32, %c0_i32_0 : i32, i32, i32
  }
  func.func @transform_1(%arg0: i32) -> (i32, i32) {
    %c0_i32 = arith.constant 0 : i32
    %c0_i32_0 = arith.constant 0 : i32
    %c0_i32_1 = arith.constant 0 : i32
    return %c0_i32, %c0_i32_0 : i32, i32
  }
  func.func @transform_2(%arg0: i32) -> (i32, i32) {
    %c0_i32 = arith.constant 0 : i32
    %c0_i32_0 = arith.constant 0 : i32
    %c0_i32_1 = arith.constant 0 : i32
    return %c0_i32, %c0_i32_0 : i32, i32
  }
  func.func @transform_3(%arg0: i32) -> (i32, i32) {
    %c0_i32 = arith.constant 0 : i32
    %c0_i32_0 = arith.constant 0 : i32
    %c0_i32_1 = arith.constant 0 : i32
    return %c0_i32, %c0_i32_0 : i32, i32
  }
  func.func @transform_4(%arg0: i32) -> (i32, i32, i32) {
    %c0_i32 = arith.constant 0 : i32
    %c0_i32_0 = arith.constant 0 : i32
    %c0_i32_1 = arith.constant 0 : i32
    %c0_i32_2 = arith.constant 0 : i32
    return %c0_i32, %c0_i32_0, %c0_i32_1 : i32, i32, i32
  }
  func.func @transform_5(%arg0: i32) -> (i32, i32, i32) {
    %c0_i32 = arith.constant 0 : i32
    %c0_i32_0 = arith.constant 0 : i32
    %c0_i32_1 = arith.constant 0 : i32
    %c0_i32_2 = arith.constant 0 : i32
    return %c0_i32, %c0_i32_0, %c0_i32_1 : i32, i32, i32
  }
  func.func @transform_6(%arg0: i32) -> (i32, i32) {
    %c0_i32 = arith.constant 0 : i32
    %c0_i32_0 = arith.constant 0 : i32
    %c0_i32_1 = arith.constant 0 : i32
    return %c0_i32, %c0_i32_0 : i32, i32
  }
  func.func @transform_7(%arg0: i32) -> (i32, i32) {
    %c0_i32 = arith.constant 0 : i32
    %c0_i32_0 = arith.constant 0 : i32
    %c0_i32_1 = arith.constant 0 : i32
    return %c0_i32, %c0_i32_0 : i32, i32
  }
  func.func @transform_8(%arg0: i32) -> (i32, i32) {
    %c0_i32 = arith.constant 0 : i32
    %c0_i32_0 = arith.constant 0 : i32
    %c0_i32_1 = arith.constant 0 : i32
    return %c0_i32, %c0_i32_0 : i32, i32
  }
  func.func @transform_9(%arg0: i32) -> (i32, i32) {
    %c0_i32 = arith.constant 0 : i32
    %c0_i32_0 = arith.constant 0 : i32
    %c0_i32_1 = arith.constant 0 : i32
    return %c0_i32, %c0_i32_0 : i32, i32
  }
  func.func @transform_10(%arg0: i32) -> (i32, i32) {
    %c0_i32 = arith.constant 0 : i32
    %c0_i32_0 = arith.constant 0 : i32
    %c0_i32_1 = arith.constant 0 : i32
    return %c0_i32, %c0_i32_0 : i32, i32
  }
  func.func @transform_11(%arg0: i32) -> (i32, i32) {
    %c0_i32 = arith.constant 0 : i32
    %c0_i32_0 = arith.constant 0 : i32
    %c0_i32_1 = arith.constant 0 : i32
    return %c0_i32, %c0_i32_0 : i32, i32
  }
  func.func @transform_12(%arg0: i32) -> (i32, i32) {
    %c0_i32 = arith.constant 0 : i32
    %c0_i32_0 = arith.constant 0 : i32
    %c0_i32_1 = arith.constant 0 : i32
    return %c0_i32, %c0_i32_0 : i32, i32
  }
  func.func @transform_13(%arg0: i32) -> (i32, i32) {
    %c0_i32 = arith.constant 0 : i32
    %c0_i32_0 = arith.constant 0 : i32
    %c0_i32_1 = arith.constant 0 : i32
    return %c0_i32, %c0_i32_0 : i32, i32
  }
  func.func @transform_14(%arg0: i32) -> (i32, i32) {
    %c0_i32 = arith.constant 0 : i32
    %c0_i32_0 = arith.constant 0 : i32
    %c0_i32_1 = arith.constant 0 : i32
    return %c0_i32, %c0_i32_0 : i32, i32
  }
  func.func @transform_15(%arg0: i32) -> (i32, i32) {
    %c0_i32 = arith.constant 0 : i32
    %c0_i32_0 = arith.constant 0 : i32
    %c0_i32_1 = arith.constant 0 : i32
    return %c0_i32, %c0_i32_0 : i32, i32
  }
  func.func @transform_16(%arg0: i32) -> (i32, i32) {
    %c0_i32 = arith.constant 0 : i32
    %c0_i32_0 = arith.constant 0 : i32
    %c0_i32_1 = arith.constant 0 : i32
    return %c0_i32, %c0_i32_0 : i32, i32
  }
  func.func @transform_17(%arg0: i32) -> (i32, i32) {
    %c0_i32 = arith.constant 0 : i32
    %c0_i32_0 = arith.constant 0 : i32
    %c0_i32_1 = arith.constant 0 : i32
    return %c0_i32, %c0_i32_0 : i32, i32
  }
  func.func @transform_18(%arg0: i32) -> (i32, i32, i32) {
    %c0_i32 = arith.constant 0 : i32
    %c0_i32_0 = arith.constant 0 : i32
    %c0_i32_1 = arith.constant 0 : i32
    return %arg0, %c0_i32, %c0_i32_0 : i32, i32, i32
  }
}

</mosaic_0001>

<bundles_post_ra>
// kernel: _lambda_.1
= control target key start
LH: loop header
LB: loop body
LE: loop exit
PB: predicated region body
PF: predicated region fallthrough
CT: control target
= control target key end

     0   :  { %s5177_s0 = inlined_call_operand.vmem [shape: bf16[2,256,32], index: 0, kind: input, shape index: {}]   ;;  %s5178_s1 = inlined_call_operand.vmem [shape: bf16[32,32], index: 1, kind: input, shape index: {}]   ;;  %s5179_s2 = inlined_call_operand.vmem [shape: f32[1,32], index: 2, kind: input, shape index: {}]   ;;  %s5180_s3 = inlined_call_operand.vmem [shape: f32[1,32], index: 3, kind: input, shape index: {}]   ;;  %s5181_s4 = inlined_call_operand.vmem [shape: bf16[9,32,32], index: 4, kind: input, shape index: {}]   ;;  %s5182_s5 = inlined_call_operand.vmem [shape: f32[9,64,1], index: 5, kind: input, shape index: {}]   ;;  %s5183_s6 = inlined_call_operand.vmem [shape: f32[1,32], index: 6, kind: input, shape index: {}]   ;;  %s5184_s7 = inlined_call_operand.vmem [shape: f32[1,32], index: 7, kind: input, shape index: {}]   ;;  %s5185_s8 = inlined_call_operand.vmem [shape: f32[32,8], index: 8, kind: input, shape index: {}]   ;;  %s5186_s9 = inlined_call_operand.vmem [shape: f32[1,8], index: 9, kind: input, shape index: {}]   ;;  %s5187_s10 = inlined_call_operand.vmem [shape: f32[8,32], index: 10, kind: input, shape index: {}]   ;;  %s5188_s11 = inlined_call_operand.vmem [shape: f32[1,32], index: 11, kind: input, shape index: {}]   ;;  %s5189_s12 = inlined_call_operand.vmem [shape: bf16[32,64], index: 12, kind: input, shape index: {}]   ;;  %s5190_s13 = inlined_call_operand.vmem [shape: f32[1,64], index: 13, kind: input, shape index: {}]   ;;  %s5191_s14 = inlined_call_operand.vmem [shape: f32[1,64], index: 14, kind: input, shape index: {}]   ;;  %s5192_s15 = inlined_call_operand.vmem [shape: bf16[32,64], index: 15, kind: input, shape index: {}]   ;;  %s5193_s16 = inlined_call_operand.vmem [shape: f32[1,64], index: 16, kind: input, shape index: {}]   ;;  %s5194_s17 = inlined_call_operand.vmem [shape: f32[1,64], index: 17, kind: input, shape index: {}]   ;;  %s5195_s18 = inlined_call_operand.hbm [shape: f32[2,64,64], index: 18, kind: output, shape index: {}]  }
   0x1   :  { %5220 = sst [smem:[#allocation35_spill]] %s5177_s0 }
   0x2   :  { %5221 = sst [smem:[#allocation36_spill]] %s5178_s1 }
   0x3   :  { %5222 = sst [smem:[#allocation37_spill]] %s5179_s2 }
   0x4   :  { %5223 = sst [smem:[#allocation38_spill]] %s5195_s18 }
   0x5   :  { %23 = vsyncpa [#allocation4], 0 }
   0x6   :  { %25 = vsyncpa [#allocation4 + $0x1], 0  ;;  %s4022_s27 = smov 0   ;;  %s4024_s28 = smov 0  }
   0x7   :  { %s4026_s29 = smov 0   ;;  %s4028_s30 = smov 0  }
   0x8 LB: > { %5224 = sst [smem:[#allocation6_spill]] %s3906_s27  ;;  %s4043_s0 = sadd.s32 4294967295, %s3918_s30   ;;  %s3918_s30 = sphi %s4028_s30, %s5295_s30   ;;  %s3914_s29 = sphi %s4026_s29, %s5297_s29   ;;  %s3910_s28 = sphi %s4024_s28, %s5299_s28   ;;  %s3906_s27 = sphi %s4022_s27, %s5298_s27  }
   0x9   : > { %5225 = sst [smem:[#allocation7_spill]] %s3914_s29  ;;  %s3196_s19 = sadd.s32 4294967294, %s3918_s30  }
   0xa   : > { %5226 = sst [smem:[#allocation8_spill]] %s3918_s30  ;;  %s4047_s1 = sadd.s32 1, %s3918_s30  }
   0xb   : > { %5227 = sst [smem:[#allocation9_spill]] %s4047_s1  ;;  %s421_s20 = sadd.s32 1, %s3914_s29 }
   0xc   : > { %s418_s21 = ssub.s32 %s3918_s30, %s4047_s1  ;;  %p431_p0 = scmp.ne.s32.totalorder %s3914_s29, %s3910_s28 }
   0xd   : > { %p419_p1 = scmp.eq.s32.totalorder %s418_s21, 0  ;;  %p432_p2 = scmp.eq.s32.totalorder %s4043_s0, 1 }
   0xe   : > { %p437_p3 = scmp.ne.s32.totalorder %s3910_s28, %s3906_s27  ;;  %p438_p4 = scmp.eq.s32.totalorder %s3196_s19, 1 }
   0xf   : > { %s4058_s22 = scalar_select %p419_p1, %s3914_s29, %s421_s20  }
  0x10   : > { %p4060_p5 = por %p432_p2, %p431_p0  ;;  %p4064_p6 = por %p438_p4, %p437_p3 }
  0x11   : > { %5228 = sst [smem:[#allocation10_spill]] %s4058_s22  ;;  %p3199_p7 = scmp.ge.s32.totalorder %s3918_s30, 1 }
  0x12   : > { %s5229_s2 = scalar_select %p4060_p5, 1, 0 }
  0x13   : > { %s5231_s23 = scalar_select %p4064_p6, 1, 0 }
  0x14   : > { %5230 = sst [smem:[#allocation11_spill]] %s5229_s2  ;;  %p515_p8 = scmp.lt.s32.totalorder %s3918_s30, 3 }
  0x15   : > { %5232 = sst [smem:[#allocation12_spill]] %s5231_s23 }
  0x16   : > { %p516_p9 = pnand %p3199_p7, %p515_p8 }
  0x18   : > { %519 = sbr.rel (%p516_p9) target bundleno = 1418 (0x58a), region = 92 }
  0x1f   : > { %v1113_v0 = vld [vmem:[%s5182_s5 + $0x10] sm:$0xff]  ;;  %v1111_v1 = vld [vmem:[%s5182_s5] sm:$0xff]  ;;  %p569_p10 = scmp.lt.s32.totalorder %s4043_s0, 1  ;;  %v3920_v2 = vmov 0   ;;  %s5233_s22 = sld [smem:[#allocation36_spill]]  ;;  %vm703_vm0 = vcmask 261120  }
  0x20   : > { %3807 = vset.pattern.permute.xlu1 %v3920_v2  ;;  %3806 = vset.pattern.permute.xlu0 %v3920_v2  ;;  %v5206_v4 = vmov 0.0   ;;  %v1114_v5 = vld [vmem:[%s5182_s5 + $0x18] sm:$0xff]  ;;  %v1112_v6 = vld [vmem:[%s5182_s5 + $0x8] sm:$0xff]  ;;  %v1115_v9 = vld [vmem:[%s5182_s5 + $0x20] sm:$0xff]  ;;  %s5234_s2 = sld [smem:[#allocation35_spill]]  ;;  %s5243_s18 = sld [smem:[#allocation37_spill]] }
  0x21   : > { %1131 = vperm.xlu1 %3807, %v1113_v0   ;;  %1121 = vperm.xlu0 %3806, %v1111_v1   ;;  %s4081_s29 = scalar_select %p569_p10, %s4043_s0, 1  ;;  %1057 = vst.msk [vmem:[#allocation2 + $0x108] sm:$0xff] %vm703_vm0, %v5206_v4  ;;  %1024 = vst.msk [vmem:[#allocation2 + $0x8] sm:$0xff] %vm703_vm0, %v5206_v4  ;;  %v1116_v8 = vld [vmem:[%s5182_s5 + $0x28] sm:$0xff]  ;;  %v1118_v13 = vld [vmem:[%s5182_s5 + $0x38] sm:$0xff]  ;;  %vm3923_vm1 = vmmov 0  }
  0x22   : > { %1025 = vst.msk [vmem:[#allocation2 + $0x10] sm:$0xff] %vm703_vm0, %v5206_v4  ;;  %1026 = vst.msk [vmem:[#allocation2 + $0x18] sm:$0xff] %vm703_vm0, %v5206_v4  ;;  %v1117_v14 = vld [vmem:[%s5182_s5 + $0x30] sm:$0xff]  ;;  %v3264_v15 = vld [vmem:[%s5182_s5 + $0x88] sm:$0xff]  ;;  %vm2766_vm2 = vcmask 64512   ;;  %vm3111_vm3 = vcmask 523264  }
  0x23   : > { %1027 = vst.msk [vmem:[#allocation2 + $0x20] sm:$0xff] %vm703_vm0, %v5206_v4  ;;  %1028 = vst.msk [vmem:[#allocation2 + $0x28] sm:$0xff] %vm703_vm0, %v5206_v4  ;;  %s3414_s1 = sshll.u32 %s4081_s29, 7  ;;  %v3263_v16 = vld [vmem:[%s5182_s5 + $0x80] sm:$0xff]  ;;  %v3266_v19 = vld [vmem:[%s5182_s5 + $0x98] sm:$0xff]  ;;  %s5291_s24 = sld [smem:[#allocation38_spill]] }
  0x24   : > { %1029 = vst.msk [vmem:[#allocation2 + $0x30] sm:$0xff] %vm703_vm0, %v5206_v4  ;;  %1030 = vst.msk [vmem:[#allocation2 + $0x38] sm:$0xff] %vm703_vm0, %v5206_v4  ;;  %v3265_v20 = vld [vmem:[%s5182_s5 + $0x90] sm:$0xff]  ;;  %v3268_v21 = vld [vmem:[%s5182_s5 + $0xa8] sm:$0xff]  ;;  %s3924_s27 = smov [#allocation3]  }
  0x25   : > { %v3808_v3 = vld [vmem:[%s5233_s22] sm:$0xff]   ;;  %1031 = vst.msk [vmem:[#allocation2 + $0x40] sm:$0xff] %vm703_vm0, %v5206_v4  ;;  %1032 = vst.msk [vmem:[#allocation2 + $0x48] sm:$0xff] %vm703_vm0, %v5206_v4  ;;  %v3809_v7 = vld [vmem:[%s5233_s22 + $0x8] sm:$0xff]   ;;  %1136 = vperm.xlu1 %3807, %v1114_v5   ;;  %1126 = vperm.xlu0 %3806, %v1112_v6   ;;  %s3860_s29 = sshll.u32 %s3924_s27, 4  ;;  %s3861_s29 = int_to_ptr.vmem [resolvable:$false] %s3860_s29 }
  0x26   : > { %1036 = vst.msk [vmem:[#allocation2 + $0x60] sm:$0xff] %vm703_vm0, %v5206_v4  ;;  %1037 = vst.msk [vmem:[#allocation2 + $0x68] sm:$0xff] %vm703_vm0, %v5206_v4  ;;  %3507 = vmatprep.subr.bf16.mxu0 %v3808_v3  ;;  %s4178_s26 = scalar_lea.vmem %s5234_s2, %s3414_s1  ;;  %v3267_v22 = vld [vmem:[%s5182_s5 + $0xa0] sm:$0xff]  ;;  %v3270_v25 = vld [vmem:[%s5182_s5 + $0xb8] sm:$0xff]  ;;  %s3415_s2 = sshll.u32 %s4043_s0, 10 }
  0x27   : > { %1038 = vst.msk [vmem:[#allocation2 + $0x70] sm:$0xff] %vm703_vm0, %v5206_v4  ;;  %1039 = vst.msk [vmem:[#allocation2 + $0x78] sm:$0xff] %vm703_vm0, %v5206_v4  ;;  %3508 = vmatpush3.bf16.msra.mxu0 %v3808_v3  ;;  %v3810_v10 = vld [vmem:[%s4178_s26] sm:$0xff]   ;;  %v3811_v11 = vld [vmem:[%s4178_s26 + $0x8] sm:$0xff]  }
  0x28   : > { %1040 = vst.msk [vmem:[#allocation2 + $0x80] sm:$0xff] %vm703_vm0, %v5206_v4  ;;  %1041 = vst.msk [vmem:[#allocation2 + $0x88] sm:$0xff] %vm703_vm0, %v5206_v4  ;;  %3509 = vmatprep.subr.bf16.mxu0 %v3809_v7  ;;  %3511 = vmatprep.mubr.msk.bf16.mxu0 %vm703_vm0, %v3810_v10  ;;  %v3812_v12 = vld [vmem:[%s4178_s26 + $0x10] sm:$0xff]   ;;  %v3813_v17 = vld [vmem:[%s4178_s26 + $0x18] sm:$0xff]  }
  0x29   : > { %1042 = vst.msk [vmem:[#allocation2 + $0x90] sm:$0xff] %vm703_vm0, %v5206_v4  ;;  %1043 = vst.msk [vmem:[#allocation2 + $0x98] sm:$0xff] %vm703_vm0, %v5206_v4  ;;  %1146 = vperm.xlu1 %3807, %v1116_v8   ;;  %1141 = vperm.xlu0 %3806, %v1115_v9   ;;  %v3814_v18 = vld [vmem:[%s4178_s26 + $0x20] sm:$0xff]   ;;  %v3815_v23 = vld [vmem:[%s4178_s26 + $0x28] sm:$0xff]  }
  0x2a   : > { %1044 = vst.msk [vmem:[#allocation2 + $0xa0] sm:$0xff] %vm703_vm0, %v5206_v4  ;;  %1046 = vst.msk [vmem:[#allocation2 + $0xb0] sm:$0xff] %vm703_vm0, %v5206_v4  ;;  %v3816_v24 = vld [vmem:[%s4178_s26 + $0x30] sm:$0xff]   ;;  %v3282_v27 = vld [vmem:[%s5182_s5 + $0xc8] sm:$0xff] }
  0x2b   : > { %1047 = vst.msk [vmem:[#allocation2 + $0xb8] sm:$0xff] %vm703_vm0, %v5206_v4  ;;  %1048 = vst.msk [vmem:[#allocation2 + $0xc0] sm:$0xff] %vm703_vm0, %v5206_v4  ;;  %3510 = vmatpush3.bf16.msra.mxu0 %v3809_v7  ;;  %v3269_v26 = vld [vmem:[%s5182_s5 + $0xb0] sm:$0xff]  ;;  %v3281_v28 = vld [vmem:[%s5182_s5 + $0xc0] sm:$0xff] }
  0x2c   : > { %1049 = vst.msk [vmem:[#allocation2 + $0xc8] sm:$0xff] %vm703_vm0, %v5206_v4  ;;  %1050 = vst.msk [vmem:[#allocation2 + $0xd0] sm:$0xff] %vm703_vm0, %v5206_v4  ;;  %v3817_v29 = vld [vmem:[%s4178_s26 + $0x38] sm:$0xff]   ;;  %v3818_v30 = vld [vmem:[%s4178_s26 + $0x40] sm:$0xff]  }
  0x2d   : > { %1051 = vst.msk [vmem:[#allocation2 + $0xd8] sm:$0xff] %vm703_vm0, %v5206_v4  ;;  %1052 = vst.msk [vmem:[#allocation2 + $0xe0] sm:$0xff] %vm703_vm0, %v5206_v4  ;;  %1156 = vperm.xlu1 %3807, %v1118_v13   ;;  %1151 = vperm.xlu0 %3806, %v1117_v14   ;;  %v3284_v31 = vld [vmem:[%s5182_s5 + $0xd8] sm:$0xff]  ;;  %v3283_v32 = vld [vmem:[%s5182_s5 + $0xd0] sm:$0xff] }
  0x2e   : > { %1053 = vst.msk [vmem:[#allocation2 + $0xe8] sm:$0xff] %vm703_vm0, %v5206_v4  ;;  %1054 = vst.msk [vmem:[#allocation2 + $0xf0] sm:$0xff] %vm703_vm0, %v5206_v4  ;;  %3512 = vmatmul.mubr.msk.bf16.vlgmr.msra.gmra.mrb[0].mxu0 %vm703_vm0, %v3811_v11  ;;  %v3286_v33 = vld [vmem:[%s5182_s5 + $0xe8] sm:$0xff]  ;;  %v3285_v34 = vld [vmem:[%s5182_s5 + $0xe0] sm:$0xff] }
  0x2f   : > { %1055 = vst.msk [vmem:[#allocation2 + $0xf8] sm:$0xff] %vm703_vm0, %v5206_v4  ;;  %1058 = vst.msk [vmem:[#allocation2 + $0x110] sm:$0xff] %vm703_vm0, %v5206_v4  ;;  %3515 = vmatprep.mubr.msk.bf16.mxu0 %vm703_vm0, %v3812_v12  ;;  %v3819_v35 = vld [vmem:[%s4178_s26 + $0x48] sm:$0xff]   ;;  %v3820_v36 = vld [vmem:[%s4178_s26 + $0x50] sm:$0xff]  }
  0x30   : > { %1059 = vst.msk [vmem:[#allocation2 + $0x118] sm:$0xff] %vm703_vm0, %v5206_v4  ;;  %1060 = vst.msk [vmem:[#allocation2 + $0x120] sm:$0xff] %vm703_vm0, %v5206_v4  ;;  %v3288_v37 = vld [vmem:[%s5182_s5 + $0xf8] sm:$0xff]  ;;  %v3287_v38 = vld [vmem:[%s5182_s5 + $0xf0] sm:$0xff] }
  0x31   : > { %1061 = vst.msk [vmem:[#allocation2 + $0x128] sm:$0xff] %vm703_vm0, %v5206_v4  ;;  %1062 = vst.msk [vmem:[#allocation2 + $0x130] sm:$0xff] %vm703_vm0, %v5206_v4  ;;  %1451 = vperm.xlu1 %3807, %v3264_v15   ;;  %1446 = vperm.xlu0 %3806, %v3263_v16   ;;  %v3300_v39 = vld [vmem:[%s5182_s5 + $0x108] sm:$0xff]  ;;  %v3299_v40 = vld [vmem:[%s5182_s5 + $0x100] sm:$0xff] }
  0x32   : > { %1063 = vst.msk [vmem:[#allocation2 + $0x138] sm:$0xff] %vm703_vm0, %v5206_v4  ;;  %1064 = vst.msk [vmem:[#allocation2 + $0x140] sm:$0xff] %vm703_vm0, %v5206_v4  ;;  %v3821_v41 = vld [vmem:[%s4178_s26 + $0x58] sm:$0xff]   ;;  %v3822_v42 = vld [vmem:[%s4178_s26 + $0x60] sm:$0xff]  }
  0x33   : > { %1065 = vst.msk [vmem:[#allocation2 + $0x148] sm:$0xff] %vm703_vm0, %v5206_v4  ;;  %1066 = vst.msk [vmem:[#allocation2 + $0x150] sm:$0xff] %vm703_vm0, %v5206_v4  ;;  %v3302_v43 = vld [vmem:[%s5182_s5 + $0x118] sm:$0xff]  ;;  %v3301_v44 = vld [vmem:[%s5182_s5 + $0x110] sm:$0xff] }
  0x34   : > { %v3304_v45 = vld [vmem:[%s5182_s5 + $0x128] sm:$0xff]  ;;  %v3303_v46 = vld [vmem:[%s5182_s5 + $0x120] sm:$0xff]  ;;  %v3824_v48 = vld [vmem:[%s4178_s26 + $0x70] sm:$0xff]  }
  0x35   : > { %1461 = vperm.xlu1 %3807, %v3266_v19   ;;  %1456 = vperm.xlu0 %3806, %v3265_v20   ;;  %v3823_v47 = vld [vmem:[%s4178_s26 + $0x68] sm:$0xff]   ;;  %v3306_v49 = vld [vmem:[%s5182_s5 + $0x138] sm:$0xff]  ;;  %v3305_v50 = vld [vmem:[%s5182_s5 + $0x130] sm:$0xff] }
  0x36   : > { %3516 = vmatmul.mubr.msk.bf16.gmra.mrb[4].mxu0 %vm703_vm0, %v3813_v17  ;;  %v3318_v51 = vld [vmem:[%s5182_s5 + $0x148] sm:$0xff]  ;;  %v3317_v52 = vld [vmem:[%s5182_s5 + $0x140] sm:$0xff]  ;;  %v3825_v53 = vld [vmem:[%s4178_s26 + $0x78] sm:$0xff]  }
  0x37   : > { %3519 = vmatprep.mubr.msk.bf16.mxu0 %vm703_vm0, %v3814_v18  ;;  %v3320_v54 = vld [vmem:[%s5182_s5 + $0x158] sm:$0xff]  ;;  %v3319_v55 = vld [vmem:[%s5182_s5 + $0x150] sm:$0xff]  ;;  %v3322_v56 = vld [vmem:[%s5182_s5 + $0x168] sm:$0xff] }
  0x38   : > { %v3321_v57 = vld [vmem:[%s5182_s5 + $0x160] sm:$0xff]  ;;  %v3324_v58 = vld [vmem:[%s5182_s5 + $0x178] sm:$0xff]  ;;  %v3323_v59 = vld [vmem:[%s5182_s5 + $0x170] sm:$0xff] }
  0x39   : > { %1471 = vperm.xlu1 %3807, %v3268_v21   ;;  %1466 = vperm.xlu0 %3806, %v3267_v22   ;;  %v3336_v60 = vld [vmem:[%s5182_s5 + $0x188] sm:$0xff]  ;;  %v3335_v61 = vld [vmem:[%s5182_s5 + $0x180] sm:$0xff]  ;;  %v3338_v62 = vld [vmem:[%s5182_s5 + $0x198] sm:$0xff] }
  0x3a   : > { %v3337_v63 = vld [vmem:[%s5182_s5 + $0x190] sm:$0xff]  ;;  %v3340_v0 = vld [vmem:[%s5182_s5 + $0x1a8] sm:$0xff]  ;;  %v3339_v1 = vld [vmem:[%s5182_s5 + $0x1a0] sm:$0xff] }
  0x3b   : > { %v3342_v2 = vld [vmem:[%s5182_s5 + $0x1b8] sm:$0xff]  ;;  %v3341_v3 = vld [vmem:[%s5182_s5 + $0x1b0] sm:$0xff]  ;;  %v3354_v5 = vld [vmem:[%s5182_s5 + $0x1c8] sm:$0xff] }
  0x3c   : > { %v3353_v6 = vld [vmem:[%s5182_s5 + $0x1c0] sm:$0xff]  ;;  %v3356_v7 = vld [vmem:[%s5182_s5 + $0x1d8] sm:$0xff]  ;;  %v3355_v8 = vld [vmem:[%s5182_s5 + $0x1d0] sm:$0xff] }
  0x3d   : > { %1481 = vperm.xlu1 %3807, %v3270_v25   ;;  %1476 = vperm.xlu0 %3806, %v3269_v26   ;;  %v3358_v9 = vld [vmem:[%s5182_s5 + $0x1e8] sm:$0xff]  ;;  %v3357_v10 = vld [vmem:[%s5182_s5 + $0x1e0] sm:$0xff]  ;;  %v3360_v11 = vld [vmem:[%s5182_s5 + $0x1f8] sm:$0xff] }
  0x3e   : > { %3520 = vmatmul.mubr.msk.bf16.gmra.mrb[8].mxu0 %vm703_vm0, %v3815_v23  ;;  %v3359_v12 = vld [vmem:[%s5182_s5 + $0x1f0] sm:$0xff]  ;;  %v3240_v13 = vld [vmem:[%s5182_s5 + $0x48] sm:$0xff]  ;;  %v3239_v14 = vld [vmem:[%s5182_s5 + $0x40] sm:$0xff] }
  0x3f   : > { %3523 = vmatprep.mubr.msk.bf16.mxu0 %vm703_vm0, %v3816_v24  ;;  %v3372_v15 = vld [vmem:[%s5182_s5 + $0x208] sm:$0xff]  ;;  %v3371_v16 = vld [vmem:[%s5182_s5 + $0x200] sm:$0xff]  ;;  %v3242_v17 = vld [vmem:[%s5182_s5 + $0x58] sm:$0xff] }
  0x40   : > { %v3241_v18 = vld [vmem:[%s5182_s5 + $0x50] sm:$0xff]  ;;  %v3374_v19 = vld [vmem:[%s5182_s5 + $0x218] sm:$0xff]  ;;  %v3244_v21 = vld [vmem:[%s5182_s5 + $0x68] sm:$0xff] }
  0x41   : > { %1622 = vperm.xlu1 %3807, %v3282_v27   ;;  %1617 = vperm.xlu0 %3806, %v3281_v28   ;;  %v3373_v20 = vld [vmem:[%s5182_s5 + $0x210] sm:$0xff]  ;;  %v3243_v22 = vld [vmem:[%s5182_s5 + $0x60] sm:$0xff]  ;;  %v3376_v25 = vld [vmem:[%s5182_s5 + $0x228] sm:$0xff] }
  0x42   : > { %v3375_v26 = vld [vmem:[%s5182_s5 + $0x220] sm:$0xff] }
  0x45   : > { %1632 = vperm.xlu1 %3807, %v3284_v31   ;;  %1627 = vperm.xlu0 %3806, %v3283_v32  }
  0x46   : > { %3524 = vmatmul.mubr.msk.bf16.gmra.mrb[12].mxu0 %vm703_vm0, %v3817_v29  ;;  %v3246_v29 = vld [vmem:[%s5182_s5 + $0x78] sm:$0xff] }
  0x47   : > { %3527 = vmatprep.mubr.msk.bf16.mxu0 %vm703_vm0, %v3818_v30  ;;  %v3245_v30 = vld [vmem:[%s5182_s5 + $0x70] sm:$0xff] }
  0x49   : > { %1642 = vperm.xlu1 %3807, %v3286_v33   ;;  %1637 = vperm.xlu0 %3806, %v3285_v34   ;;  %v3378_v33 = vld [vmem:[%s5182_s5 + $0x238] sm:$0xff]  ;;  %v3377_v34 = vld [vmem:[%s5182_s5 + $0x230] sm:$0xff] }
  0x4d   : > { %1652 = vperm.xlu1 %3807, %v3288_v37   ;;  %1647 = vperm.xlu0 %3806, %v3287_v38   ;;  %v3827_v38 = vld [vmem:[%s5181_s4 + $0x18] sm:$0xff]  }
  0x4e   : > { %3528 = vmatmul.mubr.msk.bf16.gmra.mrb[16].mxu0 %vm703_vm0, %v3819_v35  ;;  %v3826_v35 = vld [vmem:[%s5181_s4 + $0x10] sm:$0xff]  }
  0x4f   : > { %3531 = vmatprep.mubr.msk.bf16.mxu0 %vm703_vm0, %v3820_v36  ;;  %3543 = vmatprep.subr.bf16.mxu0 %v3826_v35 }
  0x50   : > { %3544 = vmatpush3.bf16.msra.mxu0 %v3826_v35 }
  0x51   : > { %1793 = vperm.xlu1 %3807, %v3300_v39   ;;  %1788 = vperm.xlu0 %3806, %v3299_v40  }
  0x52   : > { %3545 = vmatprep.subr.bf16.mxu0 %v3827_v38 }
  0x54   : > { %3546 = vmatpush3.bf16.msra.mxu0 %v3827_v38 }
  0x55   : > { %1803 = vperm.xlu1 %3807, %v3302_v43   ;;  %1798 = vperm.xlu0 %3806, %v3301_v44  }
  0x56   : > { %3532 = vmatmul.mubr.msk.bf16.gmra.mrb[20].mxu0 %vm703_vm0, %v3821_v41 }
  0x57   : > { %3535 = vmatprep.mubr.msk.bf16.mxu0 %vm703_vm0, %v3822_v42 }
  0x59   : > { %1813 = vperm.xlu1 %3807, %v3304_v45   ;;  %1808 = vperm.xlu0 %3806, %v3303_v46   ;;  %v3828_v45 = vld [vmem:[%s5181_s4] sm:$0xff]  }
  0x5a   : > { %3555 = vmatprep.subr.bf16.mxu1 %v3828_v45 }
  0x5b   : > { %3556 = vmatpush3.bf16.msra.mxu1 %v3828_v45 }
  0x5d   : > { %1823 = vperm.xlu1 %3807, %v3306_v49   ;;  %1818 = vperm.xlu0 %3806, %v3305_v50  }
  0x5e   : > { %3536 = vmatmul.mubr.msk.bf16.gmra.mrb[24].mxu0 %vm703_vm0, %v3823_v47 }
  0x5f   : > { %3539 = vmatprep.mubr.msk.bf16.mxu0 %vm703_vm0, %v3824_v48  ;;  %v3829_v48 = vld [vmem:[%s5181_s4 + $0x8] sm:$0xff]  }
  0x60   : > { %3557 = vmatprep.subr.bf16.mxu1 %v3829_v48 }
  0x61   : > { %1964 = vperm.xlu1 %3807, %v3318_v51   ;;  %1959 = vperm.xlu0 %3806, %v3317_v52   ;;  %v4461_v51 = vld [vmem:[%s5181_s4 + $0x20] sm:$0xff]  }
  0x62   : > { %3558 = vmatpush3.bf16.msra.mxu1 %v3829_v48 }
  0x63   : > { %3567 = vmatprep.subr.bf16.mxu1 %v4461_v51 }
  0x65   : > { %1974 = vperm.xlu1 %3807, %v3320_v54   ;;  %1969 = vperm.xlu0 %3806, %v3319_v55  }
  0x66   : > { %3540 = vmatmul.mubr.msk.bf16.gmra.mrb[28].mxu0 %vm703_vm0, %v3825_v53 }
  0x69   : > { %1984 = vperm.xlu1 %3807, %v3322_v56   ;;  %1979 = vperm.xlu0 %3806, %v3321_v57  }
  0x6d   : > { %1994 = vperm.xlu1 %3807, %v3324_v58   ;;  %1989 = vperm.xlu0 %3806, %v3323_v59  }
  0x71   : > { %2135 = vperm.xlu1 %3807, %v3336_v60   ;;  %2130 = vperm.xlu0 %3806, %v3335_v61  }
  0x75   : > { %2145 = vperm.xlu1 %3807, %v3338_v62   ;;  %2140 = vperm.xlu0 %3806, %v3337_v63  }
  0x79   : > { %2155 = vperm.xlu1 %3807, %v3340_v0   ;;  %2150 = vperm.xlu0 %3806, %v3339_v1  }
  0x7d   : > { %2165 = vperm.xlu1 %3807, %v3342_v2   ;;  %2160 = vperm.xlu0 %3806, %v3341_v3  }
  0x81   : > { %2306 = vperm.xlu1 %3807, %v3354_v5   ;;  %2301 = vperm.xlu0 %3806, %v3353_v6  }
  0x85   : > { %2316 = vperm.xlu1 %3807, %v3356_v7   ;;  %2311 = vperm.xlu0 %3806, %v3355_v8  }
  0x89   : > { %2326 = vperm.xlu1 %3807, %v3358_v9   ;;  %2321 = vperm.xlu0 %3806, %v3357_v10  }
  0x8d   : > { %2336 = vperm.xlu1 %3807, %v3360_v11   ;;  %2331 = vperm.xlu0 %3806, %v3359_v12  }
  0x91   : > { %1199 = vperm.xlu1 %3807, %v3240_v13   ;;  %1194 = vperm.xlu0 %3806, %v3239_v14  }
  0x95   : > { %2477 = vperm.xlu1 %3807, %v3372_v15   ;;  %2472 = vperm.xlu0 %3806, %v3371_v16  }
  0x99   : > { %1209 = vperm.xlu1 %3807, %v3242_v17   ;;  %1204 = vperm.xlu0 %3806, %v3241_v18   ;;  %v4523_v17 = vld [vmem:[%s5243_s18] ss:$0 sm:$0xff]  ;;  %s566_s18 = sand.u32 1, %s3910_s28  }
  0x9a   : > { %s3200_s30 = sshll.u32 %s566_s18, 6  ;;  %s5136_s0 = scalar_lea.sflag [#allocation4], %s566_s18 }
  0x9b   : > { %s5107_s1 = scalar_lea.vmem [#allocation3], %s3200_s30  ;;  %s3862_s30 = scalar_lea.vmem %s3861_s29, 2048 }
  0x9c   : > { %s3134_s23 = sshll.u32 %s5107_s1, 4  ;;  %s5126_s23 = int_to_ptr.vmem [resolvable:$true] %s3134_s23 }
  0x9d   : > { %2487 = vperm.xlu1 %3807, %v3374_v19   ;;  %2482 = vperm.xlu0 %3806, %v3373_v20   ;;  %s3856_s25 = scalar_lea.vmem %s5126_s23, 1024  ;;  %p3863_p0 = scmp.lt.s32.totalorder %s5126_s23, %s3861_s29 }
  0x9e   : > { %p3857_p11 = scmp.ne.s32.totalorder %s5126_s23, %s3856_s25  ;;  %p3864_p1 = scmp.lt.s32.totalorder %s3862_s30, %s3856_s25 }
  0xa0   : > { %v4392_v23 = vpop.permute.xlu1 %1131  ;;  %v4394_v24 = vpop.permute.xlu0 %1121  ;;  %p3858_p12 = pnand %p3857_p11, %p4060_p5  ;;  %p3865_p2 = por %p3864_p1, %p3863_p0 }
  0xa1   : > { %1219 = vperm.xlu1 %3807, %v3244_v21   ;;  %1214 = vperm.xlu0 %3806, %v3243_v22   ;;  %v4532_v21 = vld [vmem:[%s5180_s3] ss:$0 sm:$0xff] }
  0xa2   : > { %p3859_p13 = pneg %p3858_p12 }
  0xa4   : > { %v4402_v27 = vpop.permute.xlu1 %1136  ;;  %v4404_v28 = vpop.permute.xlu0 %1126  ;;  %p3866_p3 = pnand %p3865_p2, %p3859_p13 }
  0xa5   : > { %2497 = vperm.xlu1 %3807, %v3376_v25   ;;  %2492 = vperm.xlu0 %3806, %v3375_v26  }
  0xa8   : > { %v4412_v31 = vpop.permute.xlu1 %1146  ;;  %v4414_v32 = vpop.permute.xlu0 %1141 }
  0xa9   : > { %1229 = vperm.xlu1 %3807, %v3246_v29   ;;  %1224 = vperm.xlu0 %3806, %v3245_v30  }
  0xac   : > { %v4425_v36 = vpop.permute.xlu1 %1156  ;;  %v4427_v37 = vpop.permute.xlu0 %1151 }
  0xad   : > { %2507 = vperm.xlu1 %3807, %v3378_v33   ;;  %2502 = vperm.xlu0 %3806, %v3377_v34  }
  0xb0   : > { %v4432_v39 = vpop.permute.xlu1 %1451  ;;  %v4434_v40 = vpop.permute.xlu0 %1446 }
  0xb4   : > { %v4436_v41 = vpop.permute.xlu1 %1461  ;;  %v4438_v42 = vpop.permute.xlu0 %1456 }
  0xb8   : > { %v4440_v43 = vpop.permute.xlu1 %1471  ;;  %v4442_v44 = vpop.permute.xlu0 %1466 }
  0xbc   : > { %v4447_v46 = vpop.permute.xlu1 %1481  ;;  %v4449_v47 = vpop.permute.xlu0 %1476 }
  0xbd   : > { %5235 = vst [vmem:[#allocation13_spill] sm:$0xff] %v4447_v46 }
  0xc0   : > { %v4454_v49 = vpop.permute.xlu1 %1622  ;;  %v4456_v50 = vpop.permute.xlu0 %1617 }
  0xc1   : > { %5236 = vst [vmem:[#allocation14_spill] sm:$0xff] %v4456_v50 }
  0xc4   : > { %v4464_v52 = vpop.permute.xlu1 %1632  ;;  %v4466_v53 = vpop.permute.xlu0 %1627 }
  0xc5   : > { %5237 = vst [vmem:[#allocation15_spill] sm:$0xff] %v4464_v52  ;;  %5238 = vst [vmem:[#allocation16_spill] sm:$0xff] %v4466_v53 }
  0xc8   : > { %v4468_v54 = vpop.permute.xlu1 %1642  ;;  %v4470_v55 = vpop.permute.xlu0 %1637 }
  0xc9   : > { %5239 = vst [vmem:[#allocation17_spill] sm:$0xff] %v4468_v54  ;;  %5240 = vst [vmem:[#allocation18_spill] sm:$0xff] %v4470_v55 }
  0xcc   : > { %v4472_v56 = vpop.permute.xlu1 %1652  ;;  %v4474_v57 = vpop.permute.xlu0 %1647 }
  0xcd   : > { %5241 = vst [vmem:[#allocation19_spill] sm:$0xff] %v4472_v56  ;;  %5242 = vst [vmem:[#allocation20_spill] sm:$0xff] %v4474_v57 }
  0xd0   : > { %v4476_v58 = vpop.permute.xlu1 %1793  ;;  %v4478_v59 = vpop.permute.xlu0 %1788 }
  0xd4   : > { %v4480_v60 = vpop.permute.xlu1 %1803  ;;  %v4482_v61 = vpop.permute.xlu0 %1798 }
  0xd8   : > { %v4484_v62 = vpop.permute.xlu1 %1813  ;;  %v4486_v63 = vpop.permute.xlu0 %1808 }
  0xdc   : > { %v4488_v0 = vpop.permute.xlu1 %1823  ;;  %v4490_v1 = vpop.permute.xlu0 %1818 }
  0xe0   : > { %v4492_v2 = vpop.permute.xlu1 %1964  ;;  %v4494_v3 = vpop.permute.xlu0 %1959 }
  0xe4   : > { %v4496_v5 = vpop.permute.xlu1 %1974  ;;  %v4498_v6 = vpop.permute.xlu0 %1969 }
  0xe8   : > { %v4500_v7 = vpop.permute.xlu1 %1984  ;;  %v4502_v8 = vpop.permute.xlu0 %1979 }
  0xec   : > { %v4504_v9 = vpop.permute.xlu1 %1994  ;;  %v4506_v10 = vpop.permute.xlu0 %1989 }
  0xf0   : > { %v4508_v11 = vpop.permute.xlu1 %2135  ;;  %v4510_v12 = vpop.permute.xlu0 %2130 }
  0xf4   : > { %v4512_v13 = vpop.permute.xlu1 %2145  ;;  %v4514_v14 = vpop.permute.xlu0 %2140 }
  0xf8   : > { %v4516_v15 = vpop.permute.xlu1 %2155  ;;  %v4518_v16 = vpop.permute.xlu0 %2150 }
  0xfc   : > { %v4525_v18 = vpop.permute.xlu1 %2165  ;;  %v4527_v19 = vpop.permute.xlu0 %2160 }
  0xfd   : > { %5244 = vst [vmem:[#allocation21_spill] sm:$0xff] %v4525_v18  ;;  %5245 = vst [vmem:[#allocation22_spill] sm:$0xff] %v4527_v19 }
 0x100   : > { %v4538_v34 = vpop.permute.xlu1 %2306  ;;  %v4540_v35 = vpop.permute.xlu0 %2301 }
 0x101   : > { %v3513_v20 = vpop.f32.mrb[0].mxu0 }
 0x102   : > { %v922_v22 = vmul.f32 %v3513_v20, %v4523_v17  ;;  %v786_v25 = vpop.f32.mrb[1].mxu0 }
 0x103   : > { %v920_v26 = vmul.f32 %v4523_v17, %v786_v25  ;;  %v3514_v29 = vpop.f32.mrb[2].mxu0 }
 0x104   : > { %v961_v30 = vadd.f32 %v4532_v21, %v922_v22  ;;  %v923_v33 = vmul.f32 %v3514_v29, %v4523_v17  ;;  %v789_v45 = vpop.f32.mrb[3].mxu0  ;;  %v4547_v19 = vpop.permute.xlu1 %2316 }
 0x105   : > { %v959_v38 = vadd.f32 %v4532_v21, %v920_v26  ;;  %v921_v20 = vmul.f32 %v4523_v17, %v789_v45  ;;  %v4549_v29 = vpop.permute.xlu0 %2311 }
 0x106   : > { %v993_v48 = vmax.f32 %v961_v30, 0.0  ;;  %v962_v4 = vadd.f32 %v4532_v21, %v923_v33 }
 0x107   : > { %v991_v18 = vmax.f32 %v959_v38, 0.0  ;;  %v960_v22 = vadd.f32 %v4532_v21, %v921_v20 }
 0x108   : > { %1070 = vst.msk [vmem:[#allocation2 + $0x19] sm:$0xff] %vm703_vm0, %v993_v48  ;;  %v994_v25 = vmax.f32 %v962_v4, 0.0  ;;  %v4558_v20 = vpop.permute.xlu1 %2326 }
 0x109   : > { %1068 = vst.msk [vmem:[#allocation2 + $0x9] sm:$0xff] %vm703_vm0, %v991_v18  ;;  %v3517_v56 = vpop.f32.mrb[4].mxu0  ;;  %v992_v26 = vmax.f32 %v960_v22, 0.0  ;;  %v4560_v57 = vpop.permute.xlu0 %2321 }
 0x10a   : > { %1071 = vst.msk [vmem:[#allocation2 + $0x21] sm:$0xff] %vm703_vm0, %v994_v25  ;;  %v926_v30 = vmul.f32 %v3517_v56, %v4523_v17  ;;  %v802_v33 = vpop.f32.mrb[5].mxu0 }
 0x10b   : > { %v924_v38 = vmul.f32 %v4523_v17, %v802_v33  ;;  %v3518_v45 = vpop.f32.mrb[6].mxu0  ;;  %1069 = vst.msk [vmem:[#allocation2 + $0x11] sm:$0xff] %vm703_vm0, %v992_v26 }
 0x10c   : > { %v965_v4 = vadd.f32 %v4532_v21, %v926_v30  ;;  %v927_v48 = vmul.f32 %v3518_v45, %v4523_v17  ;;  %v805_v25 = vpop.f32.mrb[7].mxu0  ;;  %v4567_v45 = vpop.permute.xlu1 %2336 }
 0x10d   : > { %v963_v18 = vadd.f32 %v4532_v21, %v924_v38  ;;  %v925_v55 = vmul.f32 %v4523_v17, %v805_v25  ;;  %v4570_v53 = vpop.permute.xlu0 %2331 }
 0x10e   : > { %v997_v22 = vmax.f32 %v965_v4, 0.0  ;;  %v966_v56 = vadd.f32 %v4532_v21, %v927_v48 }
 0x10f   : > { %v995_v33 = vmax.f32 %v963_v18, 0.0  ;;  %v1771_v54 = vld [vmem:[#allocation2 + $0x19] sm:$0xff]  ;;  %v964_v30 = vadd.f32 %v4532_v21, %v925_v55 }
 0x110   : > { %1074 = vst.msk [vmem:[#allocation2 + $0x39] sm:$0xff] %vm703_vm0, %v997_v22  ;;  %v998_v26 = vmax.f32 %v966_v56, 0.0  ;;  %v1769_v52 = vld [vmem:[#allocation2 + $0x9] sm:$0xff]  ;;  %v4575_v22 = vmul.f32 %v4482_v61, %v1771_v54 }
 0x111   : > { %1072 = vst.msk [vmem:[#allocation2 + $0x29] sm:$0xff] %vm703_vm0, %v995_v33  ;;  %v3521_v38 = vpop.f32.mrb[8].mxu0  ;;  %v1772_v4 = vld [vmem:[#allocation2 + $0x21] sm:$0xff]  ;;  %v996_v48 = vmax.f32 %v964_v30, 0.0  ;;  %v4582_v46 = vmul.f32 %v4478_v59, %v1769_v52  ;;  %v4594_v52 = vpop.permute.xlu1 %1199 }
 0x112   : > { %1075 = vst.msk [vmem:[#allocation2 + $0x41] sm:$0xff] %vm703_vm0, %v998_v26  ;;  %v930_v18 = vmul.f32 %v3521_v38, %v4523_v17  ;;  %v818_v25 = vpop.f32.mrb[9].mxu0  ;;  %5246 = vst [vmem:[#allocation23_spill] sm:$0xff] %v4575_v22  ;;  %v4578_v55 = vmul.f32 %v4480_v60, %v1772_v4  ;;  %v1770_v33 = vld [vmem:[#allocation2 + $0x11] sm:$0xff] }
 0x113   : > { %v928_v56 = vmul.f32 %v4523_v17, %v818_v25  ;;  %v3522_v50 = vpop.f32.mrb[10].mxu0  ;;  %1073 = vst.msk [vmem:[#allocation2 + $0x31] sm:$0xff] %vm703_vm0, %v996_v48  ;;  %v4588_v38 = vmul.f32 %v4476_v58, %v1770_v33 }
 0x114   : > { %5247 = vst [vmem:[#allocation24_spill] sm:$0xff] %v4578_v55  ;;  %v969_v26 = vadd.f32 %v4532_v21, %v930_v18  ;;  %v931_v30 = vmul.f32 %v3522_v50, %v4523_v17  ;;  %v821_v61 = vpop.f32.mrb[11].mxu0  ;;  %v4599_v18 = vpop.permute.xlu0 %1194 }
 0x115   : > { %v967_v60 = vadd.f32 %v4532_v21, %v928_v56  ;;  %v929_v59 = vmul.f32 %v4523_v17, %v821_v61 }
 0x116   : > { %v1001_v4 = vmax.f32 %v969_v26, 0.0  ;;  %v970_v25 = vadd.f32 %v4532_v21, %v931_v30 }
 0x117   : > { %v999_v50 = vmax.f32 %v967_v60, 0.0  ;;  %v1775_v58 = vld [vmem:[#allocation2 + $0x39] sm:$0xff]  ;;  %v968_v56 = vadd.f32 %v4532_v21, %v929_v59 }
 0x118   : > { %1079 = vst.msk [vmem:[#allocation2 + $0x71] sm:$0xff] %vm703_vm0, %v1001_v4  ;;  %v1002_v33 = vmax.f32 %v970_v25, 0.0  ;;  %v1773_v54 = vld [vmem:[#allocation2 + $0x29] sm:$0xff]  ;;  %v4607_v60 = vmul.f32 %v4490_v1, %v1775_v58 }
 0x119   : > { %1077 = vst.msk [vmem:[#allocation2 + $0x61] sm:$0xff] %vm703_vm0, %v999_v50  ;;  %v3525_v26 = vpop.f32.mrb[12].mxu0  ;;  %v1776_v30 = vld [vmem:[#allocation2 + $0x41] sm:$0xff]  ;;  %v1000_v61 = vmax.f32 %v968_v56, 0.0  ;;  %v4614_v50 = vmul.f32 %v4486_v63, %v1773_v54 }
 0x11a   : > { %1080 = vst.msk [vmem:[#allocation2 + $0x79] sm:$0xff] %vm703_vm0, %v1002_v33  ;;  %v934_v22 = vmul.f32 %v3525_v26, %v4523_v17  ;;  %v834_v48 = vpop.f32.mrb[13].mxu0  ;;  %5248 = vst [vmem:[#allocation25_spill] sm:$0xff] %v4607_v60  ;;  %v4610_v55 = vmul.f32 %v4488_v0, %v1776_v30  ;;  %v1774_v59 = vld [vmem:[#allocation2 + $0x31] sm:$0xff]  ;;  %v4617_v33 = vpop.permute.xlu1 %2477 }
 0x11b   : > { %v932_v4 = vmul.f32 %v4523_v17, %v834_v48  ;;  %v3526_v25 = vpop.f32.mrb[14].mxu0  ;;  %5250 = vst [vmem:[#allocation27_spill] sm:$0xff] %v4614_v50  ;;  %1078 = vst.msk [vmem:[#allocation2 + $0x69] sm:$0xff] %vm703_vm0, %v1000_v61  ;;  %v4622_v1 = vmul.f32 %v4484_v62, %v1774_v59  ;;  %v4626_v48 = vpop.permute.xlu0 %2472 }
 0x11c   : > { %5249 = vst [vmem:[#allocation26_spill] sm:$0xff] %v4610_v55  ;;  %v973_v56 = vadd.f32 %v4532_v21, %v934_v22  ;;  %v935_v26 = vmul.f32 %v3526_v25, %v4523_v17  ;;  %v837_v63 = vpop.f32.mrb[15].mxu0 }
 0x11d   : > { %5251 = vst [vmem:[#allocation28_spill] sm:$0xff] %v4622_v1  ;;  %v971_v58 = vadd.f32 %v4532_v21, %v932_v4  ;;  %v933_v61 = vmul.f32 %v4523_v17, %v837_v63 }
 0x11e   : > { %v1005_v54 = vmax.f32 %v973_v56, 0.0  ;;  %v974_v30 = vadd.f32 %v4532_v21, %v935_v26  ;;  %v4637_v56 = vpop.permute.xlu1 %1209 }
 0x11f   : > { %v1003_v25 = vmax.f32 %v971_v58, 0.0  ;;  %v972_v59 = vadd.f32 %v4532_v21, %v933_v61  ;;  %v1942_v0 = vld [vmem:[#allocation2 + $0x71] sm:$0xff] }
 0x120   : > { %1083 = vst.msk [vmem:[#allocation2 + $0x91] sm:$0xff] %vm703_vm0, %v1005_v54  ;;  %v1006_v62 = vmax.f32 %v974_v30, 0.0  ;;  %v1940_v22 = vld [vmem:[#allocation2 + $0x61] sm:$0xff]  ;;  %v4643_v54 = vpop.permute.xlu0 %1204  ;;  %v4647_v50 = vmul.f32 %v4498_v6, %v1942_v0 }
 0x121   : > { %1081 = vst.msk [vmem:[#allocation2 + $0x81] sm:$0xff] %vm703_vm0, %v1003_v25  ;;  %v3529_v60 = vpop.f32.mrb[16].mxu0  ;;  %v1943_v4 = vld [vmem:[#allocation2 + $0x79] sm:$0xff]  ;;  %v1004_v26 = vmax.f32 %v972_v59, 0.0 }
 0x122   : > { %1084 = vst.msk [vmem:[#allocation2 + $0x99] sm:$0xff] %vm703_vm0, %v1006_v62  ;;  %v938_v63 = vmul.f32 %v3529_v60, %v4523_v17  ;;  %v850_v55 = vpop.f32.mrb[17].mxu0  ;;  %v4641_v58 = vmul.f32 %v4496_v5, %v1943_v4  ;;  %v1941_v25 = vld [vmem:[#allocation2 + $0x69] sm:$0xff]  ;;  %5253 = vst [vmem:[#allocation30_spill] sm:$0xff] %v4647_v50  ;;  %v4654_v5 = vmul.f32 %v4494_v3, %v1940_v22 }
 0x123   : > { %v936_v30 = vmul.f32 %v4523_v17, %v850_v55  ;;  %v3530_v61 = vpop.f32.mrb[18].mxu0  ;;  %1082 = vst.msk [vmem:[#allocation2 + $0x89] sm:$0xff] %vm703_vm0, %v1004_v26  ;;  %v4657_v4 = vmul.f32 %v4492_v2, %v1941_v25 }
 0x124   : > { %5252 = vst [vmem:[#allocation29_spill] sm:$0xff] %v4641_v58  ;;  %v977_v62 = vadd.f32 %v4532_v21, %v938_v63  ;;  %v939_v60 = vmul.f32 %v3530_v61, %v4523_v17  ;;  %v853_v1 = vpop.f32.mrb[19].mxu0  ;;  %5254 = vst [vmem:[#allocation31_spill] sm:$0xff] %v4654_v5  ;;  %v4669_v25 = vpop.permute.xlu0 %2482 }
 0x125   : > { %v975_v59 = vadd.f32 %v4532_v21, %v936_v30  ;;  %5255 = vst [vmem:[#allocation32_spill] sm:$0xff] %v4657_v4  ;;  %v937_v26 = vmul.f32 %v4523_v17, %v853_v1  ;;  %v4665_v30 = vpop.permute.xlu1 %2487 }
 0x126   : > { %v1009_v6 = vmax.f32 %v977_v62, 0.0  ;;  %v978_v0 = vadd.f32 %v4532_v21, %v939_v60 }
 0x127   : > { %v1007_v63 = vmax.f32 %v975_v59, 0.0  ;;  %v976_v2 = vadd.f32 %v4532_v21, %v937_v26  ;;  %v1946_v22 = vld [vmem:[#allocation2 + $0x91] sm:$0xff] }
 0x128   : > { %1088 = vst.msk [vmem:[#allocation2 + $0xc9] sm:$0xff] %vm703_vm0, %v1009_v6  ;;  %v1010_v3 = vmax.f32 %v978_v0, 0.0  ;;  %v1944_v61 = vld [vmem:[#allocation2 + $0x81] sm:$0xff]  ;;  %v4679_v58 = vmul.f32 %v4506_v10, %v1946_v22  ;;  %v1175_v10 = vld [vmem:[#allocation2 + $0xb1] sm:$0xff] }
 0x129   : > { %1086 = vst.msk [vmem:[#allocation2 + $0xb9] sm:$0xff] %vm703_vm0, %v1007_v63  ;;  %v3533_v62 = vpop.f32.mrb[20].mxu0  ;;  %v1947_v60 = vld [vmem:[#allocation2 + $0x99] sm:$0xff]  ;;  %v1008_v1 = vmax.f32 %v976_v2, 0.0  ;;  %v4686_v5 = vmul.f32 %v4502_v8, %v1944_v61  ;;  %v1220_v22 = vpop.permute.xlu1 %1219 }
 0x12a   : > { %1089 = vst.msk [vmem:[#allocation2 + $0xd1] sm:$0xff] %vm703_vm0, %v1010_v3  ;;  %v942_v59 = vmul.f32 %v3533_v62, %v4523_v17  ;;  %v866_v55 = vpop.f32.mrb[21].mxu0  ;;  %v4675_v50 = vmul.f32 %v4504_v9, %v1947_v60  ;;  %v1945_v26 = vld [vmem:[#allocation2 + $0x89] sm:$0xff]  ;;  %5257 = vst [vmem:[#allocation34_spill] sm:$0xff] %v4679_v58 }
 0x12b   : > { %v940_v6 = vmul.f32 %v4523_v17, %v866_v55  ;;  %v3534_v0 = vpop.f32.mrb[22].mxu0  ;;  %1087 = vst.msk [vmem:[#allocation2 + $0xc1] sm:$0xff] %vm703_vm0, %v1008_v1  ;;  %v4689_v9 = vmul.f32 %v4500_v7, %v1945_v26 }
 0x12c   : > { %5256 = vst [vmem:[#allocation33_spill] sm:$0xff] %v4675_v50  ;;  %v981_v63 = vadd.f32 %v4532_v21, %v942_v59  ;;  %v943_v3 = vmul.f32 %v3534_v0, %v4523_v17  ;;  %v869_v62 = vpop.f32.mrb[23].mxu0  ;;  %v1215_v0 = vpop.permute.xlu0 %1214 }
 0x12d   : > { %v979_v2 = vadd.f32 %v4532_v21, %v940_v6  ;;  %v941_v59 = vmul.f32 %v4523_v17, %v869_v62 }
 0x12e   : > { %v1013_v60 = vmax.f32 %v981_v63, 0.0  ;;  %v982_v1 = vadd.f32 %v4532_v21, %v943_v3  ;;  %v1232_v63 = vmul.f32 %v4599_v18, %v1175_v10 }
 0x12f   : > { %v1011_v4 = vmax.f32 %v979_v2, 0.0  ;;  %v1178_v6 = vld [vmem:[#allocation2 + $0xc9] sm:$0xff]  ;;  %v980_v61 = vadd.f32 %v4532_v21, %v941_v59 }
 0x130   : > { %1092 = vst.msk [vmem:[#allocation2 + $0xe9] sm:$0xff] %vm703_vm0, %v1013_v60  ;;  %v1014_v7 = vmax.f32 %v982_v1, 0.0  ;;  %v1176_v26 = vld [vmem:[#allocation2 + $0xb9] sm:$0xff]  ;;  %v4700_v55 = vmul.f32 %v4549_v29, %v1178_v6  ;;  %v1235_v50 = vmul.f32 %v4637_v56, %v1178_v6 }
 0x131   : > { %v1179_v3 = vld [vmem:[#allocation2 + $0xd1] sm:$0xff]  ;;  %1090 = vst.msk [vmem:[#allocation2 + $0xd9] sm:$0xff] %vm703_vm0, %v1011_v4  ;;  %v3537_v62 = vpop.f32.mrb[24].mxu0  ;;  %v1233_v2 = vmul.f32 %v4594_v52, %v1176_v26  ;;  %v4706_v58 = vmul.f32 %v4540_v35, %v1176_v26  ;;  %v1012_v60 = vmax.f32 %v980_v61, 0.0  ;;  %v4715_v52 = vpop.permute.xlu1 %2497 }
 0x132   : > { %1093 = vst.msk [vmem:[#allocation2 + $0xf1] sm:$0xff] %vm703_vm0, %v1014_v7  ;;  %v946_v1 = vmul.f32 %v3537_v62, %v4523_v17  ;;  %v882_v59 = vpop.f32.mrb[25].mxu0  ;;  %v4711_v29 = vmul.f32 %v4547_v19, %v1179_v3  ;;  %v1177_v4 = vld [vmem:[#allocation2 + $0xc1] sm:$0xff]  ;;  %v4724_v62 = vpop.permute.xlu0 %2492 }
 0x133   : > { %v944_v18 = vmul.f32 %v4523_v17, %v882_v59  ;;  %v3538_v10 = vpop.f32.mrb[26].mxu0  ;;  %v1240_v8 = vpack.c.bf16 %v1233_v2, %v1232_v63  ;;  %1091 = vst.msk [vmem:[#allocation2 + $0xe1] sm:$0xff] %vm703_vm0, %v1012_v60  ;;  %v1234_v26 = vmul.f32 %v4643_v54, %v1177_v4  ;;  %v4722_v19 = vmul.f32 %v4538_v34, %v1177_v4 }
 0x134   : > { %v985_v35 = vadd.f32 %v4532_v21, %v946_v1  ;;  %v947_v7 = vmul.f32 %v3538_v10, %v4523_v17  ;;  %v885_v61 = vpop.f32.mrb[27].mxu0 }
 0x135   : > { %v983_v63 = vadd.f32 %v4532_v21, %v944_v18  ;;  %v945_v56 = vmul.f32 %v4523_v17, %v885_v61  ;;  %3547 = vmatprep.mubr.msk.bf16.mxu0 %vm703_vm0, %v1240_v8  ;;  %v1241_v1 = vpack.c.bf16 %v1235_v50, %v1234_v26  ;;  %v2347_v54 = vpack.c.bf16 %v4722_v19, %v4706_v58 }
 0x136   : > { %v1017_v2 = vmax.f32 %v985_v35, 0.0  ;;  %v986_v60 = vadd.f32 %v4532_v21, %v947_v7  ;;  %v1236_v35 = vmul.f32 %v1215_v0, %v1179_v3  ;;  %v1225_v0 = vpop.permute.xlu0 %1224 }
 0x137   : > { %v1182_v34 = vld [vmem:[#allocation2 + $0xe9] sm:$0xff]  ;;  %v1015_v59 = vmax.f32 %v983_v63, 0.0  ;;  %v984_v10 = vadd.f32 %v4532_v21, %v945_v56  ;;  %3548 = vmatmul.mubr.msk.bf16.vlgmr.msra.gmra.mrb[32].mxu0 %vm703_vm0, %v1241_v1  ;;  %v1230_v56 = vpop.permute.xlu1 %1229 }
 0x138   : > { %1097 = vst.msk [vmem:[#allocation2 + $0x121] sm:$0xff] %vm703_vm0, %v1017_v2  ;;  %v1018_v18 = vmax.f32 %v986_v60, 0.0  ;;  %v1180_v8 = vld [vmem:[#allocation2 + $0xd9] sm:$0xff]  ;;  %v4738_v4 = vmul.f32 %v4570_v53, %v1182_v34  ;;  %v1239_v53 = vmul.f32 %v1230_v56, %v1182_v34 }
 0x139   : > { %1095 = vst.msk [vmem:[#allocation2 + $0x111] sm:$0xff] %vm703_vm0, %v1015_v59  ;;  %v1016_v50 = vmax.f32 %v984_v10, 0.0  ;;  %v3541_v7 = vpop.f32.mrb[28].mxu0  ;;  %v1237_v61 = vmul.f32 %v1220_v22, %v1180_v8  ;;  %v4742_v26 = vmul.f32 %v4560_v57, %v1180_v8  ;;  %v2289_v63 = vld [vmem:[#allocation2 + $0xf1] sm:$0xff] }
 0x13a   : > { %1098 = vst.msk [vmem:[#allocation2 + $0x129] sm:$0xff] %vm703_vm0, %v1018_v18  ;;  %v950_v2 = vmul.f32 %v3541_v7, %v4523_v17  ;;  %v898_v60 = vpop.f32.mrb[29].mxu0  ;;  %v4747_v1 = vmul.f32 %v4567_v45, %v2289_v63  ;;  %v1181_v57 = vld [vmem:[#allocation2 + $0xe1] sm:$0xff]  ;;  %v2503_v19 = vpop.permute.xlu0 %2502 }
 0x13b   : > { %1096 = vst.msk [vmem:[#allocation2 + $0x119] sm:$0xff] %vm703_vm0, %v1016_v50  ;;  %v948_v3 = vmul.f32 %v4523_v17, %v898_v60  ;;  %v3542_v22 = vpop.f32.mrb[30].mxu0  ;;  %v1242_v59 = vpack.c.bf16 %v1237_v61, %v1236_v35  ;;  %v1238_v6 = vmul.f32 %v1225_v0, %v1181_v57  ;;  %v4754_v7 = vmul.f32 %v4558_v20, %v1181_v57  ;;  %v1103_v35 = vld [vmem:[#allocation2 + $0x108] sm:$0xff] }
 0x13c   : > { %v989_v10 = vadd.f32 %v4532_v21, %v950_v2  ;;  %v951_v8 = vmul.f32 %v3542_v22, %v4523_v17  ;;  %v901_v18 = vpop.f32.mrb[31].mxu0  ;;  %v2350_v50 = vpack.c.bf16 %v4747_v1, %v4738_v4 }
 0x13d   : > { %v987_v45 = vadd.f32 %v4532_v21, %v948_v3  ;;  %v949_v34 = vmul.f32 %v4523_v17, %v901_v18  ;;  %3551 = vmatprep.mubr.msk.bf16.mxu0 %vm703_vm0, %v1242_v59  ;;  %v1243_v56 = vpack.c.bf16 %v1239_v53, %v1238_v6  ;;  %v2349_v2 = vpack.c.bf16 %v4754_v7, %v4742_v26 }
 0x13e   : > { %v1021_v61 = vmax.f32 %v989_v10, 0.0  ;;  %v990_v63 = vadd.f32 %v4532_v21, %v951_v8  ;;  %v1159_v6 = vmul.f32 %v4394_v24, %v1103_v35 }
 0x13f   : > { %v1019_v60 = vmax.f32 %v987_v45, 0.0  ;;  %v988_v20 = vadd.f32 %v4532_v21, %v949_v34  ;;  %v4765_v0 = vld [vmem:[#allocation2 + $0x121] sm:$0xff]  ;;  %3552 = vmatmul.mubr.msk.bf16.gmra.mrb[36].mxu0 %vm703_vm0, %v1243_v56 }
 0x140   : > { %1101 = vst.msk [vmem:[#allocation2 + $0x141] sm:$0xff] %vm703_vm0, %v1021_v61  ;;  %v1022_v17 = vmax.f32 %v990_v63, 0.0  ;;  %v1104_v3 = vld [vmem:[#allocation2 + $0x110] sm:$0xff]  ;;  %v4771_v59 = vmul.f32 %v4669_v25, %v4765_v0 }
 0x141   : > { %v1428_v22 = vld [vmem:[#allocation2 + $0x111] sm:$0xff]  ;;  %1099 = vst.msk [vmem:[#allocation2 + $0x131] sm:$0xff] %vm703_vm0, %v1019_v60  ;;  %v1020_v53 = vmax.f32 %v988_v20, 0.0  ;;  %v1160_v21 = vmul.f32 %v4404_v28, %v1104_v3  ;;  %v1107_v57 = vld [vmem:[#allocation2 + $0x128] sm:$0xff]  ;;  %v4787_v61 = vmul.f32 %v4510_v12, %v1104_v3 }
 0x142   : > { %v1431_v10 = vld [vmem:[#allocation2 + $0x129] sm:$0xff]  ;;  %1102 = vst.msk [vmem:[#allocation2 + $0x149] sm:$0xff] %vm703_vm0, %v1022_v17  ;;  %v1105_v8 = vld [vmem:[#allocation2 + $0x118] sm:$0xff]  ;;  %v1106_v18 = vld [vmem:[#allocation2 + $0x120] sm:$0xff]  ;;  %v4778_v34 = vmul.f32 %v4512_v13, %v1107_v57  ;;  %v4781_v25 = vmul.f32 %v4626_v48, %v1428_v22  ;;  %v1163_v17 = vmul.f32 %v4414_v32, %v1107_v57 }
 0x143   : > { %v1429_v45 = vld [vmem:[#allocation2 + $0x119] sm:$0xff]  ;;  %1100 = vst.msk [vmem:[#allocation2 + $0x139] sm:$0xff] %vm703_vm0, %v1020_v53  ;;  %v1167_v24 = vpack.c.bf16 %v1160_v21, %v1159_v6  ;;  %v1161_v35 = vmul.f32 %v4392_v23, %v1105_v8  ;;  %v1162_v28 = vmul.f32 %v4402_v27, %v1106_v18  ;;  %v4790_v63 = vmul.f32 %v4508_v11, %v1105_v8  ;;  %v3831_v23 = vld [vmem:[%s5181_s4 + $0x28] sm:$0xff]   ;;  %v3832_v6 = vld [vmem:[%s5181_s4 + $0x30] sm:$0xff]  }
 0x144   : > { %v4793_v56 = vmul.f32 %v4514_v14, %v1106_v18  ;;  %v4796_v13 = vmul.f32 %v4617_v33, %v1429_v45  ;;  %v4803_v27 = vmul.f32 %v4665_v30, %v1431_v10  ;;  %v1427_v30 = vld [vmem:[#allocation2 + $0x109] sm:$0xff] }
 0x145   : > { %3559 = vmatprep.mubr.msk.bf16.mxu1 %vm703_vm0, %v1167_v24  ;;  %v1168_v48 = vpack.c.bf16 %v1162_v28, %v1161_v35  ;;  %v2176_v11 = vpack.c.bf16 %v4790_v63, %v4787_v61  ;;  %v1484_v32 = vmul.f32 %v4434_v40, %v1427_v30  ;;  %v1599_v30 = vld [vmem:[#allocation2 + $0x68] sm:$0xff] }
 0x146   : > { %v2177_v12 = vpack.c.bf16 %v4778_v34, %v4793_v56  ;;  %v2518_v14 = vpack.c.bf16 %v4796_v13, %v4781_v25  ;;  %v2519_v33 = vpack.c.bf16 %v4803_v27, %v4771_v59  ;;  %v5286_v61 = vld [vmem:[#allocation22_spill] sm:$0xff]  ;;  %v2685_v27 = vld [vmem:[%s5185_s8] sm:$0xff] }
 0x147   : > { %3560 = vmatmul.mubr.msk.bf16.vlgmr.msra.gmra.mrb[0].mxu1 %vm703_vm0, %v1168_v48  ;;  %v3843_v56 = vld [vmem:[%s5181_s4 + $0x88] sm:$0xff]  }
 0x148   : > { %3568 = vmatpush3.bf16.msra.mxu1 %v4461_v51  ;;  %v1108_v60 = vld [vmem:[#allocation2 + $0x130] sm:$0xff]  ;;  %v1485_v51 = vmul.f32 %v4432_v39, %v1428_v22  ;;  %v1488_v22 = vmul.f32 %v4442_v44, %v1431_v10  ;;  %v3834_v44 = vld [vmem:[%s5181_s4 + $0x40] sm:$0xff]  }
 0x149   : > { %v1432_v20 = vld [vmem:[#allocation2 + $0x131] sm:$0xff]  ;;  %v1164_v3 = vmul.f32 %v4412_v31, %v1108_v60  ;;  %3569 = vmatprep.subr.bf16.mxu1 %v3831_v23  ;;  %v4831_v57 = vmul.f32 %v4518_v16, %v1108_v60  ;;  %v5258_v10 = vld [vmem:[#allocation13_spill] sm:$0xff]  ;;  %v2460_v58 = vld [vmem:[#allocation2 + $0x149] sm:$0xff] }
 0x14a   : > { %v4821_v53 = vmul.f32 %v4724_v62, %v1432_v20  ;;  %v1109_v21 = vld [vmem:[#allocation2 + $0x138] sm:$0xff]  ;;  %v4823_v8 = vld [vmem:[#allocation2 + $0x140] sm:$0xff]  ;;  %v1489_v16 = vmul.f32 %v4440_v43, %v1432_v20  ;;  %v5259_v20 = vld [vmem:[#allocation14_spill] sm:$0xff] }
 0x14b   : > { %v1433_v18 = vld [vmem:[#allocation2 + $0x139] sm:$0xff]  ;;  %v1169_v24 = vpack.c.bf16 %v1164_v3, %v1163_v17  ;;  %v1165_v35 = vmul.f32 %v4427_v37, %v1109_v21  ;;  %v1166_v31 = vmul.f32 %v4425_v36, %v4823_v8  ;;  %v4834_v62 = vmul.f32 %v4516_v15, %v1109_v21  ;;  %v1600_v21 = vld [vmem:[#allocation2 + $0x70] sm:$0xff] }
 0x14c   : > { %3570 = vmatpush3.bf16.msra.mxu1 %v3831_v23  ;;  %v4837_v28 = vmul.f32 %v4715_v52, %v1433_v18  ;;  %v1492_v37 = vpack.c.bf16 %v1485_v51, %v1484_v32  ;;  %v1486_v15 = vmul.f32 %v4438_v42, %v1429_v45  ;;  %v1487_v52 = vmul.f32 %v4436_v41, %v4765_v0  ;;  %v3833_v23 = vld [vmem:[%s5181_s4 + $0x38] sm:$0xff]   ;;  %v4856_v42 = vld [vmem:[#allocation2 + $0x141] sm:$0xff] }
 0x14d   : > { %3563 = vmatprep.mubr.msk.bf16.mxu1 %vm703_vm0, %v1169_v24  ;;  %v1170_v39 = vpack.c.bf16 %v1166_v31, %v1165_v35  ;;  %3579 = vmatprep.subr.bf16.mxu1 %v3832_v6  ;;  %v2178_v36 = vpack.c.bf16 %v4834_v62, %v4831_v57  ;;  %v1494_v60 = vpack.c.bf16 %v1489_v16, %v1488_v22  ;;  %v1598_v41 = vld [vmem:[#allocation2 + $0x60] sm:$0xff]  ;;  %v1601_v51 = vld [vmem:[#allocation2 + $0x78] sm:$0xff]  ;;  %v5261_v35 = vld [vmem:[#allocation15_spill] sm:$0xff]  ;;  %v3922_v57 = vmov 0.0|0.0  }
 0x14e   : > { %v2520_v40 = vpack.c.bf16 %v4837_v28, %v4821_v53  ;;  %v1493_v48 = vpack.c.bf16 %v1487_v52, %v1486_v15  ;;  %v1490_v43 = vmul.f32 %v4449_v47, %v1433_v18  ;;  %v1656_v0 = vmul.f32 %v4454_v49, %v1599_v30  ;;  %v1603_v47 = vld [vmem:[#allocation2 + $0x88] sm:$0xff]  ;;  %v5260_v18 = vld [vmem:[#allocation16_spill] sm:$0xff]  ;;  %v1602_v31 = vld [vmem:[#allocation2 + $0x80] sm:$0xff]  ;;  %3691 = vmatprep.subr.bf16.mxu0 %v3922_v57 }
 0x14f   : > { %3564 = vmatmul.mubr.msk.bf16.gmra.mrb[4].mxu1 %vm703_vm0, %v1170_v39  ;;  %v1491_v45 = vmul.f32 %v5258_v10, %v4856_v42  ;;  %v1655_v17 = vmul.f32 %v5259_v20, %v1598_v41  ;;  %v1657_v24 = vmul.f32 %v5260_v18, %v1600_v21  ;;  %v1658_v49 = vmul.f32 %v5261_v35, %v1601_v51  ;;  %v5262_v32 = vld [vmem:[#allocation17_spill] sm:$0xff]  ;;  %v3835_v52 = vld [vmem:[%s5181_s4 + $0x48] sm:$0xff]   ;;  %v5267_v20 = vld [vmem:[#allocation24_spill] sm:$0xff] }
 0x150   : > { %3571 = vmatprep.mubr.msk.bf16.mxu1 %vm703_vm0, %v1492_v37  ;;  %v1660_v39 = vmul.f32 %v5262_v32, %v1603_v47  ;;  %v5263_v37 = vld [vmem:[#allocation18_spill] sm:$0xff]  ;;  %v5271_v21 = vld [vmem:[#allocation27_spill] sm:$0xff]  ;;  %v5274_v47 = vld [vmem:[#allocation25_spill] sm:$0xff]  ;;  %v2174_v63 = vmul.f32 %v5286_v61, %v4823_v8  ;;  %v5289_v62 = vmov 0.0  }
 0x151   : > { %v1495_v3 = vpack.c.bf16 %v1491_v45, %v1490_v43  ;;  %v1659_v15 = vmul.f32 %v5263_v37, %v1602_v31  ;;  %v1664_v16 = vpack.c.bf16 %v1658_v49, %v1657_v24  ;;  %v5265_v43 = vld [vmem:[#allocation19_spill] sm:$0xff]  ;;  %v5266_v45 = vpack.c.bf16 %v4588_v38, %v4582_v46  ;;  %v3838_v46 = vld [vmem:[%s5181_s4 + $0x60] sm:$0xff]   ;;  %v5273_v38 = vld [vmem:[#allocation26_spill] sm:$0xff]  ;;  %3659 = vmatprep.mubr.msk.f32.mxu0 %vm3923_vm1, %v5289_v62 }
 0x152   : > { %v5275_v18 = vpack.c.bf16 %v5273_v38, %v5274_v47  ;;  %v5276_v24 = vld [vmem:[#allocation32_spill] sm:$0xff]  ;;  %v5277_v35 = vld [vmem:[#allocation31_spill] sm:$0xff]  ;;  %v3839_v31 = vld [vmem:[%s5181_s4 + $0x68] sm:$0xff]  }
 0x153   : > { %v1665_v22 = vpack.c.bf16 %v1660_v39, %v1659_v15  ;;  %v5278_v49 = vpack.c.bf16 %v5276_v24, %v5277_v35  ;;  %v5279_v32 = vld [vmem:[#allocation29_spill] sm:$0xff]  ;;  %v5280_v39 = vld [vmem:[#allocation30_spill] sm:$0xff]  ;;  %v5282_v15 = vpack.c.bf16 %v4689_v9, %v4686_v5  ;;  %v3841_v5 = vld [vmem:[%s5181_s4 + $0x78] sm:$0xff]  }
 0x154   : > { %v5281_v37 = vpack.c.bf16 %v5279_v32, %v5280_v39  ;;  %v2118_v9 = vld [vmem:[#allocation2 + $0x148] sm:$0xff]  ;;  %v2687_v53 = vld [vmem:[%s5185_s8 + $0x10] sm:$0xff]  ;;  %v2688_v8 = vld [vmem:[%s5185_s8 + $0x18] sm:$0xff] }
 0x155   : > { %v3695_v28 = vpack.c.bf16 %v2688_v8, %v2687_v53 }
 0x157   : > { %3572 = vmatmul.mubr.msk.bf16.vlgmr.msra.gmra.mrb[0].mxu1 %vm703_vm0, %v1493_v48  ;;  %v1604_v48 = vld [vmem:[#allocation2 + $0x90] sm:$0xff] }
 0x158   : > { %3580 = vmatpush3.bf16.msra.mxu1 %v3832_v6  ;;  %3575 = vmatprep.mubr.msk.bf16.mxu1 %vm703_vm0, %v1494_v60  ;;  %v1663_v6 = vpack.c.bf16 %v1656_v0, %v1655_v17  ;;  %v5264_v60 = vld [vmem:[#allocation20_spill] sm:$0xff]  ;;  %v3836_v0 = vld [vmem:[%s5181_s4 + $0x50] sm:$0xff]  }
 0x159   : > { %3581 = vmatprep.subr.bf16.mxu1 %v3833_v23  ;;  %v1661_v30 = vmul.f32 %v5264_v60, %v1604_v48  ;;  %v5268_v17 = vld [vmem:[#allocation23_spill] sm:$0xff]  ;;  %v3842_v60 = vld [vmem:[%s5181_s4 + $0x80] sm:$0xff]  }
 0x15c   : > { %3582 = vmatpush3.bf16.msra.mxu1 %v3833_v23  ;;  %v1605_v23 = vld [vmem:[#allocation2 + $0x98] sm:$0xff] }
 0x15d   : > { %3591 = vmatprep.subr.bf16.mxu1 %v3834_v44  ;;  %v1662_v41 = vmul.f32 %v5265_v43, %v1605_v23 }
 0x15f   : > { %3576 = vmatmul.mubr.msk.bf16.gmra.mrb[4].mxu1 %vm703_vm0, %v1495_v3  ;;  %v1666_v10 = vpack.c.bf16 %v1662_v41, %v1661_v30  ;;  %v5269_v3 = vpack.c.bf16 %v5267_v20, %v5268_v17 }
 0x160   : > { %3583 = vmatprep.mubr.msk.bf16.mxu1 %vm703_vm0, %v1663_v6  ;;  %v5270_v6 = vld [vmem:[#allocation28_spill] sm:$0xff] }
 0x161   : > { %v5272_v51 = vpack.c.bf16 %v5270_v6, %v5271_v21 }
 0x167   : > { %3584 = vmatmul.mubr.msk.bf16.vlgmr.msra.gmra.mrb[0].mxu1 %vm703_vm0, %v1664_v16  ;;  %v3840_v16 = vld [vmem:[%s5181_s4 + $0x70] sm:$0xff]  }
 0x168   : > { %3592 = vmatpush3.bf16.msra.mxu1 %v3834_v44  ;;  %3587 = vmatprep.mubr.msk.bf16.mxu1 %vm703_vm0, %v1665_v22  ;;  %v3837_v44 = vld [vmem:[%s5181_s4 + $0x58] sm:$0xff]   ;;  %v5284_v22 = vld [vmem:[#allocation34_spill] sm:$0xff] }
 0x169   : > { %3593 = vmatprep.subr.bf16.mxu1 %v3835_v52 }
 0x16c   : > { %3594 = vmatpush3.bf16.msra.mxu1 %v3835_v52  ;;  %v5283_v52 = vld [vmem:[#allocation33_spill] sm:$0xff] }
 0x16d   : > { %3603 = vmatprep.subr.bf16.mxu1 %v3836_v0  ;;  %v5285_v48 = vpack.c.bf16 %v5283_v52, %v5284_v22 }
 0x16f   : > { %3588 = vmatmul.mubr.msk.bf16.gmra.mrb[4].mxu1 %vm703_vm0, %v1666_v10  ;;  %v3390_v10 = vld [vmem:[%s5184_s7] ss:$0 sm:$0xff] }
 0x170   : > { %3595 = vmatprep.mubr.msk.bf16.mxu1 %vm703_vm0, %v5266_v45 }
 0x177   : > { %3596 = vmatmul.mubr.msk.bf16.vlgmr.msra.gmra.mrb[0].mxu1 %vm703_vm0, %v5269_v3 }
 0x178   : > { %3604 = vmatpush3.bf16.msra.mxu1 %v3836_v0  ;;  %3599 = vmatprep.mubr.msk.bf16.mxu1 %vm703_vm0, %v5272_v51 }
 0x179   : > { %3605 = vmatprep.subr.bf16.mxu1 %v3837_v44 }
 0x17c   : > { %3606 = vmatpush3.bf16.msra.mxu1 %v3837_v44 }
 0x17d   : > { %3615 = vmatprep.subr.bf16.mxu1 %v3838_v46 }
 0x17f   : > { %3600 = vmatmul.mubr.msk.bf16.gmra.mrb[4].mxu1 %vm703_vm0, %v5275_v18 }
 0x180   : > { %3607 = vmatprep.mubr.msk.bf16.mxu1 %vm703_vm0, %v5278_v49 }
 0x187   : > { %3608 = vmatmul.mubr.msk.bf16.vlgmr.msra.gmra.mrb[0].mxu1 %vm703_vm0, %v5281_v37 }
 0x188   : > { %3616 = vmatpush3.bf16.msra.mxu1 %v3838_v46  ;;  %3611 = vmatprep.mubr.msk.bf16.mxu1 %vm703_vm0, %v5282_v15 }
 0x189   : > { %3617 = vmatprep.subr.bf16.mxu1 %v3839_v31 }
 0x18c   : > { %3618 = vmatpush3.bf16.msra.mxu1 %v3839_v31 }
 0x18d   : > { %3627 = vmatprep.subr.bf16.mxu1 %v3840_v16 }
 0x18f   : > { %3612 = vmatmul.mubr.msk.bf16.gmra.mrb[4].mxu1 %vm703_vm0, %v5285_v48 }
 0x190   : > { %3619 = vmatprep.mubr.msk.bf16.mxu1 %vm703_vm0, %v2176_v11  ;;  %v5287_v11 = vld [vmem:[#allocation21_spill] sm:$0xff] }
 0x191   : > { %v2175_v23 = vmul.f32 %v5287_v11, %v2118_v9 }
 0x193   : > { %v2179_v34 = vpack.c.bf16 %v2175_v23, %v2174_v63 }
 0x197   : > { %3620 = vmatmul.mubr.msk.bf16.vlgmr.msra.gmra.mrb[0].mxu1 %vm703_vm0, %v2177_v12  ;;  %v5288_v12 = vpack.c.bf16 %v4711_v29, %v4700_v55  ;;  %v2508_v55 = vpop.permute.xlu1 %2507 }
 0x198   : > { %3628 = vmatpush3.bf16.msra.mxu1 %v3840_v16  ;;  %3623 = vmatprep.mubr.msk.bf16.mxu1 %vm703_vm0, %v2178_v36  ;;  %v2517_v29 = vmul.f32 %v2508_v55, %v2460_v58 }
 0x199   : > { %3629 = vmatprep.subr.bf16.mxu1 %v3841_v5 }
 0x19c   : > { %3630 = vmatpush3.bf16.msra.mxu1 %v3841_v5 }
 0x19d   : > { %3639 = vmatprep.subr.bf16.mxu1 %v3842_v60 }
 0x19f   : > { %3624 = vmatmul.mubr.msk.bf16.gmra.mrb[4].mxu1 %vm703_vm0, %v2179_v34 }
 0x1a0   : > { %3631 = vmatprep.mubr.msk.bf16.mxu1 %vm703_vm0, %v2347_v54  ;;  %v2516_v54 = vmul.f32 %v2503_v19, %v4856_v42 }
 0x1a2   : > { %v2521_v4 = vpack.c.bf16 %v2517_v29, %v2516_v54 }
 0x1a7   : > { %3632 = vmatmul.mubr.msk.bf16.vlgmr.msra.gmra.mrb[0].mxu1 %vm703_vm0, %v5288_v12 }
 0x1a8   : > { %3640 = vmatpush3.bf16.msra.mxu1 %v3842_v60  ;;  %3635 = vmatprep.mubr.msk.bf16.mxu1 %vm703_vm0, %v2349_v2 }
 0x1a9   : > { %3641 = vmatprep.subr.bf16.mxu1 %v3843_v56 }
 0x1ac   : > { %3642 = vmatpush3.bf16.msra.mxu1 %v3843_v56 }
 0x1af   : > { %3636 = vmatmul.mubr.msk.bf16.gmra.mrb[4].mxu1 %vm703_vm0, %v2350_v50 }
 0x1b0   : > { %3643 = vmatprep.mubr.msk.bf16.mxu1 %vm703_vm0, %v2518_v14  ;;  %v2686_v14 = vld [vmem:[%s5185_s8 + $0x8] sm:$0xff] }
 0x1b7   : > { %3644 = vmatmul.mubr.msk.bf16.vlgmr.msra.gmra.mrb[0].mxu1 %vm703_vm0, %v2519_v33  ;;  %v3692_v33 = vpack.c.bf16 %v2686_v14, %v2685_v27 }
 0x1b8   : > { %3647 = vmatprep.mubr.msk.bf16.mxu1 %vm703_vm0, %v2520_v40  ;;  %v3389_v40 = vld [vmem:[%s5183_s6] ss:$0 sm:$0xff] }
 0x1b9   : > { %3693 = vmatpush3.bf16.msra.mxu0 %v3692_v33 }
 0x1ba   : > { %3694 = vmatprep.subr.bf16.mxu0 %v3922_v57 }
 0x1bd   : > { %3696 = vmatpush3.bf16.msra.mxu0 %v3695_v28 }
 0x1be   : > { %3662 = vmatprep.subr.mxu0 %v5289_v62 }
 0x1bf   : > { %3648 = vmatmul.mubr.msk.bf16.gmra.mrb[4].mxu1 %vm703_vm0, %v2521_v4 }
 0x20a   : > { %v3549_v26 = vpop.f32.mrb[32].mxu0 }
 0x20b   : > { %v1307_v1 = vpop.f32.mrb[33].mxu0 }
 0x20c   : > { %v3550_v7 = vpop.f32.mrb[34].mxu0 }
 0x20d   : > { %v1310_v50 = vpop.f32.mrb[35].mxu0 }
 0x212   : > { %v3553_v2 = vpop.f32.mrb[36].mxu0 }
 0x213   : > { %v1323_v59 = vpop.f32.mrb[37].mxu0 }
 0x214   : > { %v3554_v25 = vpop.f32.mrb[38].mxu0 }
 0x215   : > { %v1326_v13 = vpop.f32.mrb[39].mxu0 }
 0x28a   : > { %v3645_v36 = vpop.f32.mrb[0].mxu1 }
 0x28b   : > { %v3697_v42 = vadd.f32 %v3645_v36, %v3549_v26  ;;  %v2585_v30 = vpop.f32.mrb[1].mxu1 }
 0x28c   : > { %v3698_v43 = vadd.f32 %v2585_v30, %v1307_v1  ;;  %v3646_v41 = vpop.f32.mrb[2].mxu1 }
 0x28d   : > { %v2633_v0 = vmul.f32 %v3697_v42, %v3389_v40  ;;  %v3699_v45 = vadd.f32 %v3646_v41, %v3550_v7  ;;  %v2588_v44 = vpop.f32.mrb[3].mxu1  ;;  %v2689_v42 = vld [vmem:[%s5186_s9] sm:$0x1] }
 0x28e   : > { %v2631_v20 = vmul.f32 %v3698_v43, %v3389_v40  ;;  %v3700_v17 = vadd.f32 %v2588_v44, %v1310_v50  ;;  %v2765_v44 = vld [vmem:[%s5188_s11] sm:$0x1] }
 0x28f   : > { %v2634_v3 = vmul.f32 %v3699_v45, %v3389_v40  ;;  %v5003_v6 = vadd.f32 %v3390_v10, %v2633_v0  ;;  %v3846_v45 = vld [vmem:[%s5192_s15] sm:$0xff]  }
 0x290   : > { %v5005_v21 = vadd.f32 %v3390_v10, %v2631_v20  ;;  %v2632_v51 = vmul.f32 %v3700_v17, %v3389_v40 }
 0x291   : > { %v5007_v46 = vadd.f32 %v3390_v10, %v2634_v3  ;;  %v2656_v49 = vmax.f32 %v5003_v6, 0.0 }
 0x292   : > { %v2654_v38 = vmax.f32 %v5005_v21, 0.0  ;;  %v5010_v47 = vadd.f32 %v3390_v10, %v2632_v51  ;;  %v3649_v18 = vpop.f32.mrb[4].mxu1  ;;  %v3847_v21 = vld [vmem:[%s5192_s15 + $0x8] sm:$0xff]  }
 0x293   : > { %v3701_v24 = vadd.f32 %v3649_v18, %v3553_v2  ;;  %v2601_v35 = vpop.f32.mrb[5].mxu1  ;;  %v2657_v37 = vmax.f32 %v5007_v46, 0.0  ;;  %v2665_v11 = vsel %vm703_vm0, %v2656_v49, 0.0 }
 0x294   : > { %v2655_v31 = vmax.f32 %v5010_v47, 0.0  ;;  %v3702_v32 = vadd.f32 %v2601_v35, %v1323_v59  ;;  %v3650_v39 = vpop.f32.mrb[6].mxu1  ;;  %v2662_v22 = vsel %vm703_vm0, %v2654_v38, 0.0 }
 0x295   : > { %v2637_v15 = vmul.f32 %v3701_v24, %v3389_v40  ;;  %v3703_v16 = vadd.f32 %v3650_v39, %v3554_v25  ;;  %v2604_v52 = vpop.f32.mrb[7].mxu1  ;;  %v2667_v12 = vsel %vm703_vm0, %v2657_v37, 0.0 }
 0x296   : > { %v2663_v48 = vsel %vm703_vm0, %v2655_v31, 0.0  ;;  %v2635_v5 = vmul.f32 %v3702_v32, %v3389_v40  ;;  %v3704_v9 = vadd.f32 %v2604_v52, %v1326_v13  ;;  %v2845_v32 = vlaneseq }
 0x297   : > { %v2664_v61 = vadd.f32 %v2663_v48, %v2662_v22  ;;  %v2638_v63 = vmul.f32 %v3703_v16, %v3389_v40  ;;  %v5024_v23 = vadd.f32 %v3390_v10, %v2637_v15 }
 0x298   : > { %v5026_v60 = vadd.f32 %v3390_v10, %v2635_v5  ;;  %v2636_v34 = vmul.f32 %v3704_v9, %v3389_v40  ;;  %v2764_v40 = vld [vmem:[%s5187_s10] sm:$0xff]  ;;  %v2846_v39 = vshrl.u32 %v2845_v32, 7 }
 0x299   : > { %v2666_v56 = vadd.f32 %v2665_v11, %v2664_v61  ;;  %v5032_v55 = vadd.f32 %v3390_v10, %v2638_v63  ;;  %v2660_v54 = vmax.f32 %v5024_v23, 0.0 }
 0x29a   : > { %v2658_v58 = vmax.f32 %v5026_v60, 0.0  ;;  %v2651_v29 = vadd.f32 %v3390_v10, %v2636_v34  ;;  %v3844_v10 = vld [vmem:[%s5189_s12] sm:$0xff]   ;;  %v2847_v15 = vsub.s32 0, %v2846_v39  ;;  %v3855_v34 = vld [vmem:[%s4178_s26 + $0x18] sm:$0xff]  }
 0x29b   : > { %v2668_v19 = vadd.f32 %v2667_v12, %v2666_v56  ;;  %v2661_v7 = vmax.f32 %v5032_v55, 0.0  ;;  %v2673_v59 = vsel %vm703_vm0, %v2660_v54, 0.0 }
 0x29c   : > { %v2669_v4 = vsel %vm703_vm0, %v2658_v58, 0.0  ;;  %v2659_v26 = vmax.f32 %v2651_v29, 0.0 }
 0x29d   : > { %v2670_v1 = vadd.f32 %v2669_v4, %v2668_v19  ;;  %v2675_v13 = vsel %vm703_vm0, %v2661_v7, 0.0  ;;  %v3399_v4 = vld [vmem:[%s5190_s13] ss:$0 sm:$0xff] }
 0x29e   : > { %v2671_v50 = vsel %vm703_vm0, %v2659_v26, 0.0 }
 0x29f   : > { %v2672_v2 = vadd.f32 %v2671_v50, %v2670_v1 }
 0x2a1   : > { %v2674_v25 = vadd.f32 %v2673_v59, %v2672_v2  ;;  %v3408_v59 = vld [vmem:[%s5194_s17] ss:$0 sm:$0xff] }
 0x2a3   : > { %v2676_v27 = vadd.f32 %v2675_v13, %v2674_v25 }
 0x2a5   : > { %v2677_v14 = vrot.slane %v2676_v27, 4 }
 0x2a7   : > { %v2678_v33 = vadd.f32 %v2677_v14, %v2676_v27 }
 0x2a9   : > { %v2679_v53 = vrot.slane %v2678_v33, 2 }
 0x2ab   : > { %v2680_v8 = vadd.f32 %v2679_v53, %v2678_v33 }
 0x2ad   : > { %v2681_v57 = vrot.slane %v2680_v8, 1 }
 0x2af   : > { %v2682_v28 = vadd.f32 %v2681_v57, %v2680_v8 }
 0x2b1   : > { %v2684_v36 = vmul.f32 0.015625, %v2682_v28 }
 0x2b3   : > { %3660 = vmatmul.mubr.msk.f32.vlgmr.msra.gmra.mrb[40].mxu0 %vm703_vm0, %v2684_v36 }
 0x2b4   : > { %3664 = vmatprep.mubr.msk.f32.mxu0 %vm3923_vm1, %v5289_v62  ;;  %3663 = vmatpush3.msra.mxu0 %v2764_v40  ;;  %v3845_v62 = vld [vmem:[%s5189_s12 + $0x8] sm:$0xff]  }
 0x2b5   : > { %3667 = vmatprep.subr.bf16.mxu0 %v3844_v10 }
 0x386   : > { %v2759_v30 = vpop.f32.mrb[40].mxu0 }
 0x387   : > { %v2760_v43 = vadd.f32 %v2759_v30, %v2689_v42  ;;  %v3661_v41 = vpop.f32.mrb[41].mxu0 }
 0x389   : > { %v2763_v0 = vmax.f32 %v2760_v43, 0.0 }
 0x38b   : > { %3665 = vmatmul.mubr.msk.f32.vlgmr.msra.gmra.mrb[42].mxu0 %vm2766_vm2, %v2763_v0 }
 0x38c   : > { %3668 = vmatpush3.bf16.msra.mxu0 %v3844_v10 }
 0x38d   : > { %3669 = vmatprep.subr.bf16.mxu0 %v3845_v62 }
 0x390   : > { %3670 = vmatpush3.bf16.msra.mxu0 %v3845_v62 }
 0x391   : > { %3679 = vmatprep.subr.bf16.mxu0 %v3846_v45 }
 0x45e   : > { %v2836_v20 = vpop.f32.mrb[42].mxu0 }
 0x45f   : > { %v2837_v17 = vadd.f32 %v2836_v20, %v2765_v44  ;;  %v3666_v3 = vpop.f32.mrb[43].mxu0 }
 0x461   : > { %v2840_v51 = vsub.f32 0.0, %v2837_v17 }
 0x463   : > { %v2841_v18 = vmul.f32 1.442695, %v2840_v51 }
 0x465   : > { %3848 = vpow2.f32 %v2841_v18 }
 0x46f   : > { %v3849_v24 = vpop.eup %3848 }
 0x470   : > { %v2843_v35 = vadd.f32 1.0, %v3849_v24 }
 0x472   : > { %3850 = vrcp.f32 %v2843_v35 }
 0x47c   : > { %v3851_v16 = vpop.eup %3850 }
 0x47d   : > { %v2848_v52 = vrot.slane %v3851_v16, %v2847_v15 }
 0x47f   : > { %v2849_v22 = vmul.f32 %v2848_v52, %v2654_v38  ;;  %v2850_v48 = vmul.f32 %v2848_v52, %v2655_v31  ;;  %v2851_v5 = vmul.f32 %v2848_v52, %v2656_v49  ;;  %v2852_v9 = vmul.f32 %v2848_v52, %v2657_v37  ;;  %v3852_v49 = vld [vmem:[%s4178_s26] sm:$0xff]   ;;  %v3853_v31 = vld [vmem:[%s4178_s26 + $0x8] sm:$0xff]   ;;  %v3854_v37 = vld [vmem:[%s4178_s26 + $0x10] sm:$0xff]   ;;  %s5124_s26 = scalar_lea.hbm %s5291_s24, %s3415_s2 }
 0x480   : > { %v2853_v61 = vmul.f32 %v2848_v52, %v2658_v58  ;;  %v2854_v63 = vmul.f32 %v2848_v52, %v2659_v26  ;;  %v2855_v6 = vmul.f32 %v2848_v52, %v2660_v54  ;;  %v2856_v46 = vmul.f32 %v2848_v52, %v2661_v7  ;;  %v3407_v26 = vld [vmem:[%s5193_s16] ss:$0 sm:$0xff] }
 0x481   : > { %v2857_v11 = vpack.c.bf16 %v2850_v48, %v2849_v22  ;;  %v2858_v60 = vpack.c.bf16 %v2852_v9, %v2851_v5  ;;  %v3400_v7 = vld [vmem:[%s5191_s14] ss:$0 sm:$0xff] }
 0x482   : > { %v2859_v38 = vpack.c.bf16 %v2854_v63, %v2853_v61  ;;  %v2860_v47 = vpack.c.bf16 %v2856_v46, %v2855_v6 }
 0x483   : > { %3671 = vmatprep.mubr.msk.bf16.mxu0 %vm703_vm0, %v2857_v11 }
 0x484   : > { %3672 = vmatmul.mubr.msk.bf16.vlgmr.msra.gmra.mrb[44].mxu0 %vm703_vm0, %v2858_v60 }
 0x485   : > { %3680 = vmatpush3.bf16.msra.mxu0 %v3846_v45  ;;  %3675 = vmatprep.mubr.msk.bf16.mxu0 %vm703_vm0, %v2859_v38 }
 0x486   : > { %3681 = vmatprep.subr.bf16.mxu0 %v3847_v21 }
 0x489   : > { %3682 = vmatpush3.bf16.msra.mxu0 %v3847_v21 }
 0x48c   : > { %3676 = vmatmul.mubr.msk.bf16.gmra.mrb[48].mxu0 %vm703_vm0, %v2860_v47 }
 0x48d   : > { %3683 = vmatprep.mubr.msk.bf16.mxu0 %vm703_vm0, %v3852_v49 }
 0x494   : > { %3684 = vmatmul.mubr.msk.bf16.vlgmr.msra.gmra.mrb[52].mxu0 %vm703_vm0, %v3853_v31 }
 0x495   : > { %3687 = vmatprep.mubr.msk.bf16.mxu0 %vm703_vm0, %v3854_v37 }
 0x49c   : > { %3688 = vmatmul.mubr.msk.bf16.gmra.mrb[56].mxu0 %vm703_vm0, %v3855_v34 }
 0x557   : > { %v3673_v23 = vpop.f32.mrb[44].mxu0 }
 0x558   : > { %v2923_v56 = vpop.f32.mrb[45].mxu0  ;;  %v2963_v1 = vmul.f32 %v3673_v23, %v3399_v4 }
 0x559   : > { %v3674_v12 = vpop.f32.mrb[46].mxu0  ;;  %v2961_v50 = vmul.f32 %v3399_v4, %v2923_v56 }
 0x55a   : > { %v2926_v58 = vpop.f32.mrb[47].mxu0  ;;  %v2964_v25 = vmul.f32 %v3674_v12, %v3399_v4  ;;  %v2978_v8 = vadd.f32 %v3400_v7, %v2963_v1 }
 0x55b   : > { %v2962_v14 = vmul.f32 %v3399_v4, %v2926_v58  ;;  %v2976_v40 = vadd.f32 %v3400_v7, %v2961_v50 }
 0x55c   : > { %v2979_v43 = vadd.f32 %v3400_v7, %v2964_v25 }
 0x55d   : > { %v2977_v10 = vadd.f32 %v3400_v7, %v2962_v14 }
 0x55f   : > { %v3677_v55 = vpop.f32.mrb[48].mxu0 }
 0x560   : > { %v2939_v29 = vpop.f32.mrb[49].mxu0  ;;  %v2967_v44 = vmul.f32 %v3677_v55, %v3399_v4 }
 0x561   : > { %v3678_v19 = vpop.f32.mrb[50].mxu0  ;;  %v2965_v3 = vmul.f32 %v3399_v4, %v2939_v29 }
 0x562   : > { %v2942_v54 = vpop.f32.mrb[51].mxu0  ;;  %v2968_v35 = vmul.f32 %v3678_v19, %v3399_v4  ;;  %v2982_v5 = vadd.f32 %v3400_v7, %v2967_v44 }
 0x563   : > { %v2966_v16 = vmul.f32 %v3399_v4, %v2942_v54  ;;  %v2980_v11 = vadd.f32 %v3400_v7, %v2965_v3 }
 0x564   : > { %v2983_v38 = vadd.f32 %v3400_v7, %v2968_v35 }
 0x565   : > { %v2981_v47 = vadd.f32 %v3400_v7, %v2966_v16 }
 0x567   : > { %v3685_v2 = vpop.f32.mrb[52].mxu0 }
 0x568   : > { %v3074_v13 = vmul.f32 %v3685_v2, %v3407_v26  ;;  %v3034_v27 = vpop.f32.mrb[53].mxu0 }
 0x569   : > { %v3072_v33 = vmul.f32 %v3407_v26, %v3034_v27  ;;  %v3686_v53 = vpop.f32.mrb[54].mxu0 }
 0x56a   : > { %v3089_v57 = vadd.f32 %v3408_v59, %v3074_v13  ;;  %v3075_v28 = vmul.f32 %v3686_v53, %v3407_v26  ;;  %v3037_v36 = vpop.f32.mrb[55].mxu0 }
 0x56b   : > { %v3087_v42 = vadd.f32 %v3408_v59, %v3072_v33  ;;  %v3073_v30 = vmul.f32 %v3407_v26, %v3037_v36 }
 0x56c   : > { %v3097_v41 = vadd.f32 %v3089_v57, %v2978_v8  ;;  %v3090_v0 = vadd.f32 %v3408_v59, %v3075_v28 }
 0x56d   : > { %v3095_v62 = vadd.f32 %v3087_v42, %v2976_v40  ;;  %v3088_v45 = vadd.f32 %v3408_v59, %v3073_v30 }
 0x56e   : > { %v3105_v20 = vmax.f32 %v3097_v41, 0.0  ;;  %v3098_v17 = vadd.f32 %v3090_v0, %v2979_v43 }
 0x56f   : > { %v3103_v51 = vmax.f32 %v3095_v62, 0.0  ;;  %v3096_v18 = vadd.f32 %v3088_v45, %v2977_v10  ;;  %v3689_v24 = vpop.f32.mrb[56].mxu0 }
 0x570   : > { %3114 = vst.msk [vmem:[%s5107_s1 + $0x10] sm:$0xff] %vm3111_vm3, %v3105_v20  ;;  %v3106_v32 = vmax.f32 %v3098_v17, 0.0  ;;  %v3078_v39 = vmul.f32 %v3689_v24, %v3407_v26  ;;  %v3050_v15 = vpop.f32.mrb[57].mxu0 }
 0x571   : > { %3112 = vst.msk [vmem:[%s5107_s1] sm:$0xff] %vm3111_vm3, %v3103_v51  ;;  %v3104_v52 = vmax.f32 %v3096_v18, 0.0  ;;  %v3076_v22 = vmul.f32 %v3407_v26, %v3050_v15  ;;  %v3690_v48 = vpop.f32.mrb[58].mxu0 }
 0x572   : > { %3115 = vst.msk [vmem:[%s5107_s1 + $0x18] sm:$0xff] %vm3111_vm3, %v3106_v32  ;;  %v3093_v9 = vadd.f32 %v3408_v59, %v3078_v39  ;;  %v3079_v61 = vmul.f32 %v3690_v48, %v3407_v26  ;;  %v3053_v63 = vpop.f32.mrb[59].mxu0 }
 0x573   : > { %3113 = vst.msk [vmem:[%s5107_s1 + $0x8] sm:$0xff] %vm3111_vm3, %v3104_v52  ;;  %v3091_v60 = vadd.f32 %v3408_v59, %v3076_v22  ;;  %v3077_v21 = vmul.f32 %v3407_v26, %v3053_v63 }
 0x574   : > { %v3101_v6 = vadd.f32 %v3093_v9, %v2982_v5  ;;  %v3094_v46 = vadd.f32 %v3408_v59, %v3079_v61 }
 0x575   : > { %v3099_v49 = vadd.f32 %v3091_v60, %v2980_v11  ;;  %v3092_v31 = vadd.f32 %v3408_v59, %v3077_v21 }
 0x576   : > { %v3109_v37 = vmax.f32 %v3101_v6, 0.0  ;;  %v3102_v34 = vadd.f32 %v3094_v46, %v2983_v38 }
 0x577   : > { %v3107_v23 = vmax.f32 %v3099_v49, 0.0  ;;  %v3100_v56 = vadd.f32 %v3092_v31, %v2981_v47 }
 0x578   : > { %3118 = vst.msk [vmem:[%s5107_s1 + $0x30] sm:$0xff] %vm3111_vm3, %v3109_v37  ;;  %v3110_v12 = vmax.f32 %v3102_v34, 0.0 }
 0x579   : > { %3116 = vst.msk [vmem:[%s5107_s1 + $0x20] sm:$0xff] %vm3111_vm3, %v3107_v23  ;;  %v3108_v58 = vmax.f32 %v3100_v56, 0.0 }
 0x57a   : > { %3119 = vst.msk [vmem:[%s5107_s1 + $0x38] sm:$0xff] %vm3111_vm3, %v3110_v12 }
 0x57b   : > { %3117 = vst.msk [vmem:[%s5107_s1 + $0x28] sm:$0xff] %vm3111_vm3, %v3108_v58 }
 0x57c   : > { %3869 = shalt.err (!%p3866_p3)
}
 0x57d   : > { %s3870_s18 = scalar_lea.hbm %s5124_s26, 1024  ;;  %s3874_s20 = scalar_lea.hbm %s5291_s24, 2048 }
 0x57e   : > { %p3871_p4 = scmp.ne.s32.totalorder %s5124_s26, %s3870_s18  ;;  %p3875_p9 = scmp.lt.u32.totalorder %s5124_s26, %s5291_s24 }
 0x57f   : > { %p3876_p10 = scmp.lt.u32.totalorder %s3874_s20, %s3870_s18  ;;  %p3878_p12 = scmp.lt.u32.totalorder %s3870_s18, %s5124_s26 }
 0x580   : > { %p3872_p7 = pnand %p3871_p4, %p4060_p5 }
 0x581   : > { %p3877_p11 = por %p3876_p10, %p3875_p9 }
 0x582   : > { %p3873_p8 = pneg %p3872_p7 }
 0x583   : > { %p3879_p13 = por %p3878_p12, %p3877_p11 }
 0x585   : > { %p3880_p0 = pnand %p3879_p13, %p3873_p8 }
 0x587   : > { %3883 = shalt.err (!%p3880_p0)
}
 0x588   : > { %s3925_s25 = smov 128   ;;  %s3926_s29 = smov 8  }
 0x589   : > { %3761 = dma.vmem_to_hbm [thread:$0]  (%p4060_p5), %s5126_s23, 1024, %s5124_s26, %s5136_s0, %s3925_s25, %s3925_s25, %s3926_s29  }
 0x58a PF: > { %s5292_s30 = sld [smem:[#allocation8_spill]]  ;;  %s5293_s1 = sld [smem:[#allocation6_spill]] }
 0x590   : > { %p3767_p1 = scmp.ge.s32.totalorder %s5292_s30, 2  ;;  %s3149_s21 = sand.u32 1, %s5293_s1  }
 0x591   : > { %s3150_s18 = scalar_lea.sflag [#allocation4], %s3149_s21 }
 0x592   : > { %p3764_p2 = pnand %p3767_p1, %p4064_p6 }
 0x594   : > { %3901 = dma.done.wait (!%p3764_p2), %s3150_s18, 1024  }
 0x595   : > { %3903 = vsyncadd (!%p3764_p2), %s3150_s18, 4294966272  ;;  %s5295_s30 = sld [smem:[#allocation9_spill]]  ;;  %s5296_s20 = sld [smem:[#allocation7_spill]] }
 0x596   : > { %s5297_s29 = sld [smem:[#allocation10_spill]]  ;;  %s5298_s27 = smov %s3910_s28 }
 0x59b   : > { %p28_p3 = scmp.ge.s32.totalorder %s5295_s30, 4   ;;  %s5299_s28 = smov %s5296_s20 }
 0x59d   :  { %30 = sbr.rel (!%p28_p3) target bundleno = 8 (0x8), region = 146 }
 0x5a4   :  { %3155 = vsyncpa [#allocation4], 1 }
 0x5a5   :  { %3157 = vsyncpa [#allocation4 + $0x1], 1 }

</bundles_post_ra>
